<compile_context>
chip_gen: v7x
topology: tpu7x:2x2x1
jax: 0.10.0
libtpu: 0.0.40
codegen_flags: <defaults>
</compile_context>

<pallas_src>
import functools

import jax
import jax.numpy as jnp
from jax.experimental import pallas as pl
from jax.experimental.pallas import tpu as pltpu

PE_OFFSET = 2
LN_EPS = 1e-5                      # torch.nn.LayerNorm default


def _vmem_limit_bytes():
    # ~80% of physical per-core VMEM, capped at 100 MiB:
    #   v5e/v6e (128 MiB) -> 100 MiB, v7x (64 MiB) -> ~51 MiB.
    cap = 64 * 1024 * 1024
    try:
        info = pltpu.get_tpu_info()
        cap = int(getattr(info, "vmem_capacity_bytes", cap))
    except Exception:
        pass
    return int(min((cap * 4) // 5, 100 * 1024 * 1024))


VMEM_LIMIT = _vmem_limit_bytes()


def _layernorm(x, g, b):
    mu = jnp.mean(x, axis=-1, keepdims=True)
    var = jnp.mean((x - mu) ** 2, axis=-1, keepdims=True)
    return (x - mu) * jax.lax.rsqrt(var + LN_EPS) * g + b


# ------------------------------------------------------------------
# Kernel 1: token-embedding row gather + learned positional embedding.
# Token ids live in SMEM (scalar prefetch) and drive the index_maps; G tokens
# are gathered per grid step so the ~0.35us per-step overhead is amortized and
# the output block is sublane-dense (G, D).
# ------------------------------------------------------------------
def _make_embed_kernel(G):
    def kernel(ids_ref, *refs):
        del ids_ref                        # used only by the index_maps
        out_ref = refs[-1]
        rows = []
        for g in range(G):
            e = refs[g][0].astype(jnp.float32)        # (1, D)
            p = refs[G + g][0].astype(jnp.float32)    # (1, D)
            rows.append(e + p)
        out_ref[0] = jnp.concatenate(rows, axis=0).astype(out_ref.dtype)
    return kernel


def run_embedding(x, emb_table, pe_table):
    B, S = x.shape
    V, D = emb_table.shape
    L = pe_table.shape[0]
    N = B * S
    G = next(g for g in (8, 4, 2, 1) if N % g == 0)
    n_grp = N // G
    ids = x.reshape(N).astype(jnp.int32)
    emb3 = emb_table.reshape(V, 1, D)      # (row, 1, D): block (1,1,D) = full minor dims
    pe3 = pe_table.reshape(L, 1, D)

    def emb_map(g):
        return lambda i, tok: (tok[i * G + g], 0, 0)

    def pe_map(g):
        # TODO(synk): assumes every sequence starts at position 0 and has length S.
        return lambda i, tok: (PE_OFFSET + ((i * G + g) % S), 0, 0)

    in_specs = ([pl.BlockSpec((1, 1, D), emb_map(g)) for g in range(G)]
                + [pl.BlockSpec((1, 1, D), pe_map(g)) for g in range(G)])

    h = pl.pallas_call(
        _make_embed_kernel(G),
        out_shape=jax.ShapeDtypeStruct((n_grp, G, D), jnp.bfloat16),
        grid_spec=pltpu.PrefetchScalarGridSpec(
            num_scalar_prefetch=1,
            grid=(n_grp,),
            in_specs=in_specs,
            out_specs=pl.BlockSpec((1, G, D), lambda i, tok: (i, 0, 0)),
        ),
        compiler_params=pltpu.CompilerParams(
            dimension_semantics=("parallel",),
            vmem_limit_bytes=VMEM_LIMIT),
    )(ids, *([emb3] * G), *([pe3] * G))
    return h.reshape(B, S, D)


# ------------------------------------------------------------------
# Kernel 2a: pre-LN multi-head causal self-attention + out-proj + residual,
# grid (batch,).  LN is computed once, QKV is one fused full-width matmul,
# ctx is built lane-dense (S, D) and the out-proj is a single full-K matmul,
# so ctx never round-trips through HBM.
# TODO(synk): for S >= ~1024 switch to flash-style Q/KV tiling with online
# softmax to keep the (S, S) intermediates out of VMEM (v7x).
# ------------------------------------------------------------------
def attn_kernel(h_ref, ln1_g_ref, ln1_b_ref, wqkv_ref, bqkv_ref, wo_ref, bo_ref,
                out_ref, *, n_heads):
    h = h_ref[0].astype(jnp.float32)                       # (S, D)
    S, D = h.shape
    dh = D // n_heads

    # LayerNorm once per batch element (hoisted out of the head loop).
    x = _layernorm(h, ln1_g_ref[...], ln1_b_ref[...])
    xb = x.astype(jnp.bfloat16)

    # Fused full-width QKV projection; 1/sqrt(dh) folded into wq/bq at prep time.
    qkv = jnp.dot(xb, wqkv_ref[...], preferred_element_type=jnp.float32) + bqkv_ref[...]
    q = qkv[:, :D]
    k = qkv[:, D:2 * D]
    v = qkv[:, 2 * D:]

    # Causal mask computed once, reused by every head (no (S, S) HBM input).
    row = jax.lax.broadcasted_iota(jnp.int32, (S, S), 0)
    col = jax.lax.broadcasted_iota(jnp.int32, (S, S), 1)
    causal = row >= col

    parts = []
    for hd in range(n_heads):
        sl = slice(hd * dh, (hd + 1) * dh)
        qh = q[:, sl].astype(jnp.bfloat16)
        kh = k[:, sl].astype(jnp.bfloat16)
        vh = v[:, sl].astype(jnp.bfloat16)
        s = jnp.einsum('qd,kd->qk', qh, kh, preferred_element_type=jnp.float32)
        s = jnp.where(causal, s, -jnp.inf)
        m = jnp.max(s, axis=-1, keepdims=True)
        e = jnp.exp(s - m)
        inv = pl.reciprocal(jnp.sum(e, axis=-1, keepdims=True), approx=True)
        ctx_h = jnp.dot(e.astype(jnp.bfloat16), vh, preferred_element_type=jnp.float32)
        parts.append(ctx_h * inv)          # deferred normalization: S*dh mults, not S*S
    ctx = jnp.concatenate(parts, axis=-1).astype(jnp.bfloat16)   # lane-dense (S, D)

    # Single full-K output projection + residual.
    attn = jnp.dot(ctx, wo_ref[...], preferred_element_type=jnp.float32) + bo_ref[...]
    out_ref[0] = (h + attn).astype(out_ref.dtype)


# ------------------------------------------------------------------
# Kernel 2b: pre-LN ReLU MLP + residual, grid (batch, seq tile, d_ff tile).
# The d_ff axis is an inner "arbitrary" accumulation axis so only a (D, TF)
# slice of w1 / (TF, D) slice of w2 is resident at a time.
# ------------------------------------------------------------------
def mlp_kernel(h_ref, ln2_g_ref, ln2_b_ref, w1_ref, b1_ref, w2_ref, b2_ref,
               out_ref, xln_ref, acc_ref):
    f = pl.program_id(2)

    @pl.when(f == 0)
    def _():
        x2 = _layernorm(h_ref[0].astype(jnp.float32), ln2_g_ref[...], ln2_b_ref[...])
        xln_ref[...] = x2.astype(jnp.bfloat16)
        acc_ref[...] = jnp.zeros_like(acc_ref)

    ff = jnp.dot(xln_ref[...], w1_ref[...], preferred_element_type=jnp.float32) + b1_ref[...]
    ff = jnp.maximum(ff, 0.0)
    acc_ref[...] += jnp.dot(ff.astype(jnp.bfloat16), w2_ref[...],
                            preferred_element_type=jnp.float32)

    @pl.when(f == pl.num_programs(2) - 1)
    def _():
        out_ref[0] = (h_ref[0].astype(jnp.float32) + acc_ref[...] + b2_ref[...]
                      ).astype(out_ref.dtype)


# ------------------------------------------------------------------
# Kernel 3: final LayerNorm + LM head (no bias), tiled over the vocab axis.
# LN is computed once per batch element (vocab is the inner "arbitrary" axis).
# ------------------------------------------------------------------
def head_kernel(h_ref, g_ref, b_ref, w_ref, out_ref, xln_ref):
    @pl.when(pl.program_id(1) == 0)
    def _():
        xln_ref[...] = _layernorm(h_ref[0].astype(jnp.float32),
                                  g_ref[...], b_ref[...]).astype(jnp.bfloat16)
    out_ref[0] = jnp.dot(xln_ref[...], w_ref[...], preferred_element_type=jnp.float32)


# ------------------------------------------------------------------
# Wrappers
# ------------------------------------------------------------------
def run_decoder_layer(h, p, n_heads):
    B, S, D = h.shape
    F = p["w1"].shape[1]

    # ---- attention + out-proj + residual: grid (batch,) ----
    h1 = pl.pallas_call(
        functools.partial(attn_kernel, n_heads=n_heads),
        out_shape=jax.ShapeDtypeStruct((B, S, D), jnp.bfloat16),
        grid=(B,),
        in_specs=[
            pl.BlockSpec((1, S, D), lambda b: (b, 0, 0)),
            pl.BlockSpec((1, D), lambda b: (0, 0)),
            pl.BlockSpec((1, D), lambda b: (0, 0)),
            pl.BlockSpec((D, 3 * D), lambda b: (0, 0)),
            pl.BlockSpec((1, 3 * D), lambda b: (0, 0)),
            pl.BlockSpec((D, D), lambda b: (0, 0)),
            pl.BlockSpec((1, D), lambda b: (0, 0)),
        ],
        out_specs=pl.BlockSpec((1, S, D), lambda b: (b, 0, 0)),
        compiler_params=pltpu.CompilerParams(
            dimension_semantics=("parallel",),
            vmem_limit_bytes=VMEM_LIMIT),
        cost_estimate=pl.CostEstimate(
            flops=B * (8 * S * D * D + 4 * S * S * D),
            transcendentals=B * n_heads * S * S,
            bytes_accessed=4 * B * S * D + 8 * D * D),
    )(h, p["ln1_g"], p["ln1_b"], p["wqkv"], p["bqkv"], p["wo"], p["bo"])

    # ---- MLP + residual: grid (batch, seq tile, d_ff tile) ----
    TS = 256 if S % 256 == 0 else S
    n_s = S // TS
    if F % 128 == 0:
        TF = next(t for t in (2048, 1024, 512, 256, 128) if F % t == 0)
    else:
        TF = F
    n_f = F // TF

    out = pl.pallas_call(
        mlp_kernel,
        out_shape=jax.ShapeDtypeStruct((B, S, D), jnp.bfloat16),
        grid=(B, n_s, n_f),
        in_specs=[
            pl.BlockSpec((1, TS, D), lambda b, s, f: (b, s, 0)),
            pl.BlockSpec((1, D), lambda b, s, f: (0, 0)),
            pl.BlockSpec((1, D), lambda b, s, f: (0, 0)),
            pl.BlockSpec((D, TF), lambda b, s, f: (0, f)),
            pl.BlockSpec((1, TF), lambda b, s, f: (0, f)),
            pl.BlockSpec((TF, D), lambda b, s, f: (f, 0)),
            pl.BlockSpec((1, D), lambda b, s, f: (0, 0)),
        ],
        out_specs=pl.BlockSpec((1, TS, D), lambda b, s, f: (b, s, 0)),
        scratch_shapes=[pltpu.VMEM((TS, D), jnp.bfloat16),
                        pltpu.VMEM((TS, D), jnp.float32)],
        compiler_params=pltpu.CompilerParams(
            dimension_semantics=("parallel", "parallel", "arbitrary"),
            vmem_limit_bytes=VMEM_LIMIT),
        cost_estimate=pl.CostEstimate(
            flops=4 * B * S * D * F,
            transcendentals=0,
            bytes_accessed=4 * D * F + 4 * B * S * D),
    )(h1, p["ln2_g"], p["ln2_b"], p["w1"], p["b1"], p["w2"], p["b2"])
    return out


def run_head(h, g, b, w, vocab_size):
    B, S, D = h.shape
    Vp = w.shape[1]                   # padded to a multiple of 128 at prepare time
    TV = next(t for t in (512, 256, 128) if Vp % t == 0) if Vp % 128 == 0 else Vp
    n_v = Vp // TV
    logits = pl.pallas_call(
        head_kernel,
        out_shape=jax.ShapeDtypeStruct((B, S, Vp), jnp.float32),
        grid=(B, n_v),
        in_specs=[
            pl.BlockSpec((1, S, D), lambda bi, j: (bi, 0, 0)),
            pl.BlockSpec((1, D), lambda bi, j: (0, 0)),
            pl.BlockSpec((1, D), lambda bi, j: (0, 0)),
            pl.BlockSpec((D, TV), lambda bi, j: (0, j)),
        ],
        out_specs=pl.BlockSpec((1, S, TV), lambda bi, j: (bi, 0, j)),
        scratch_shapes=[pltpu.VMEM((S, D), jnp.bfloat16)],
        compiler_params=pltpu.CompilerParams(
            dimension_semantics=("parallel", "arbitrary"),
            vmem_limit_bytes=VMEM_LIMIT),
        cost_estimate=pl.CostEstimate(
            flops=2 * B * S * D * Vp,
            transcendentals=0,
            bytes_accessed=2 * D * Vp + 2 * B * S * D + 4 * B * S * Vp),
    )(h, g, b, w)
    if Vp != vocab_size:
        logits = logits[..., :vocab_size]
    return logits


def opt_forward(x, params, n_heads, vocab_size):
    h = run_embedding(x, params["emb"], params["pe"])
    for layer_p in params["layers"]:
        h = run_decoder_layer(h, layer_p, n_heads)
    return run_head(h, params["final_g"], params["final_b"], params["lm_w"], vocab_size)


# ------------------------------------------------------------------
# Parameter init (torch-style layout, f32) and one-time kernel prep
# (bf16 cast, fused QKV weight, 1/sqrt(dh) folding, vocab padding).
# ------------------------------------------------------------------
def init_params(key, d_model, n_layers, max_length, vocab_size, d_ff):
    keys = jax.random.split(key, 3 + n_layers)
    std = 0.02
    params = {
        "emb": jax.random.normal(keys[0], (vocab_size, d_model), jnp.float32) * std,
        "pe": jax.random.normal(keys[1], (max_length + PE_OFFSET, d_model), jnp.float32) * std,
        "final_g": jnp.ones((1, d_model), jnp.float32),
        "final_b": jnp.zeros((1, d_model), jnp.float32),
        # nn.Linear(d_model, vocab, bias=False) weight is (V, D); stored
        # pre-transposed as (D, V) so the kernel computes x @ W.
        "lm_w": jax.random.normal(keys[2], (d_model, vocab_size), jnp.float32) * std,
        "layers": [],
    }
    for li in range(n_layers):
        lk = jax.random.split(keys[3 + li], 6)
        params["layers"].append({
            "ln1_g": jnp.ones((1, d_model), jnp.float32),
            "ln1_b": jnp.zeros((1, d_model), jnp.float32),
            "wq": jax.random.normal(lk[0], (d_model, d_model), jnp.float32) * std,
            "bq": jnp.zeros((1, d_model), jnp.float32),
            "wk": jax.random.normal(lk[1], (d_model, d_model), jnp.float32) * std,
            "bk": jnp.zeros((1, d_model), jnp.float32),
            "wv": jax.random.normal(lk[2], (d_model, d_model), jnp.float32) * std,
            "bv": jnp.zeros((1, d_model), jnp.float32),
            "wo": jax.random.normal(lk[3], (d_model, d_model), jnp.float32) * std,
            "bo": jnp.zeros((1, d_model), jnp.float32),
            "ln2_g": jnp.ones((1, d_model), jnp.float32),
            "ln2_b": jnp.zeros((1, d_model), jnp.float32),
            "w1": jax.random.normal(lk[4], (d_model, d_ff), jnp.float32) * std,
            "b1": jnp.zeros((1, d_ff), jnp.float32),
            "w2": jax.random.normal(lk[5], (d_ff, d_model), jnp.float32) * std,
            "b2": jnp.zeros((1, d_model), jnp.float32),
        })
    return params


def prepare_params(params, n_heads):
    d_model = params["emb"].shape[1]
    dh = d_model // n_heads
    scale = 1.0 / (dh ** 0.5)

    V = params["lm_w"].shape[1]
    Vp = ((V + 127) // 128) * 128
    lm_w = params["lm_w"]
    if Vp != V:
        lm_w = jnp.pad(lm_w, ((0, 0), (0, Vp - V)))

    prepared = {
        "emb": params["emb"].astype(jnp.bfloat16),
        "pe": params["pe"].astype(jnp.bfloat16),
        "final_g": params["final_g"],
        "final_b": params["final_b"],
        "lm_w": lm_w.astype(jnp.bfloat16),
        "layers": [],
    }
    for lp in params["layers"]:
        # Fold 1/sqrt(dh) into the query projection; fuse Q|K|V along columns.
        wqkv = jnp.concatenate([lp["wq"] * scale, lp["wk"], lp["wv"]], axis=1)
        bqkv = jnp.concatenate([lp["bq"] * scale, lp["bk"], lp["bv"]], axis=1)
        prepared["layers"].append({
            "ln1_g": lp["ln1_g"], "ln1_b": lp["ln1_b"],
            "wqkv": wqkv.astype(jnp.bfloat16),
            "bqkv": bqkv,                            # f32, added post-MXU
            "wo": lp["wo"].astype(jnp.bfloat16),
            "bo": lp["bo"],
            "ln2_g": lp["ln2_g"], "ln2_b": lp["ln2_b"],
            "w1": lp["w1"].astype(jnp.bfloat16), "b1": lp["b1"],
            "w2": lp["w2"].astype(jnp.bfloat16), "b2": lp["b2"],
        })
    return prepared


if __name__ == "__main__":
    d_model = 32
    n_layers = 2
    n_heads = 2
    max_length = 16
    vocab_size = 128
    d_ff = 4 * d_model
    batch = 2
    seq = 8

    key = jax.random.PRNGKey(0)
    k_tok, k_par = jax.random.split(key)
    x = jax.random.randint(k_tok, (batch, seq), 0, vocab_size, dtype=jnp.int32)
    raw_params = init_params(k_par, d_model, n_layers, max_length, vocab_size, d_ff)
    params = prepare_params(raw_params, n_heads)

    fwd = jax.jit(opt_forward, static_argnames=("n_heads", "vocab_size"))
    logits = fwd(x, params, n_heads=n_heads, vocab_size=vocab_size)
    jax.block_until_ready(logits)
    assert logits.shape == (batch, seq, vocab_size)
    assert bool(jnp.all(jnp.isfinite(logits)))
    print("KERNEL_OK")
</pallas_src>

<mosaic_0001>
module attributes {stable_mosaic.version = 11 : i64} {
  func.func @kernel(%arg0: i32, %arg1: memref<16xi32, #tpu.memory_space<smem>>, %arg2: memref<1x1x32xbf16, #tpu.memory_space<vmem>>, %arg3: memref<1x1x32xbf16, #tpu.memory_space<vmem>>, %arg4: memref<1x1x32xbf16, #tpu.memory_space<vmem>>, %arg5: memref<1x1x32xbf16, #tpu.memory_space<vmem>>, %arg6: memref<1x1x32xbf16, #tpu.memory_space<vmem>>, %arg7: memref<1x1x32xbf16, #tpu.memory_space<vmem>>, %arg8: memref<1x1x32xbf16, #tpu.memory_space<vmem>>, %arg9: memref<1x1x32xbf16, #tpu.memory_space<vmem>>, %arg10: memref<1x1x32xbf16, #tpu.memory_space<vmem>>, %arg11: memref<1x1x32xbf16, #tpu.memory_space<vmem>>, %arg12: memref<1x1x32xbf16, #tpu.memory_space<vmem>>, %arg13: memref<1x1x32xbf16, #tpu.memory_space<vmem>>, %arg14: memref<1x1x32xbf16, #tpu.memory_space<vmem>>, %arg15: memref<1x1x32xbf16, #tpu.memory_space<vmem>>, %arg16: memref<1x1x32xbf16, #tpu.memory_space<vmem>>, %arg17: memref<1x1x32xbf16, #tpu.memory_space<vmem>>, %arg18: memref<1x8x32xbf16, #tpu.memory_space<vmem>>) attributes {dimension_semantics = [#tpu.dimension_semantics<parallel>], iteration_bounds = array<i64: 2>, scalar_prefetch = 1 : i64, scratch_operands = 0 : i64, tpu.core_type = #tpu.core_type<tc>, window_params = [{transform_indices = @transform_0, window_bounds = array<i64: 1, 1, 32>}, {transform_indices = @transform_1, window_bounds = array<i64: 1, 1, 32>}, {transform_indices = @transform_2, window_bounds = array<i64: 1, 1, 32>}, {transform_indices = @transform_3, window_bounds = array<i64: 1, 1, 32>}, {transform_indices = @transform_4, window_bounds = array<i64: 1, 1, 32>}, {transform_indices = @transform_5, window_bounds = array<i64: 1, 1, 32>}, {transform_indices = @transform_6, window_bounds = array<i64: 1, 1, 32>}, {transform_indices = @transform_7, window_bounds = array<i64: 1, 1, 32>}, {transform_indices = @transform_8, window_bounds = array<i64: 1, 1, 32>}, {transform_indices = @transform_9, window_bounds = array<i64: 1, 1, 32>}, {transform_indices = @transform_10, window_bounds = array<i64: 1, 1, 32>}, {transform_indices = @transform_11, window_bounds = array<i64: 1, 1, 32>}, {transform_indices = @transform_12, window_bounds = array<i64: 1, 1, 32>}, {transform_indices = @transform_13, window_bounds = array<i64: 1, 1, 32>}, {transform_indices = @transform_14, window_bounds = array<i64: 1, 1, 32>}, {transform_indices = @transform_15, window_bounds = array<i64: 1, 1, 32>}, {transform_indices = @transform_16, window_bounds = array<i64: 1, 8, 32>}]} {
    %c0 = arith.constant 0 : index
    %c0_0 = arith.constant 0 : index
    %c0_1 = arith.constant 0 : index
    %0 = vector.load %arg2[%c0, %c0_0, %c0_1] : memref<1x1x32xbf16, #tpu.memory_space<vmem>>, vector<1x1x32xbf16>
    %1 = vector.shape_cast %0 : vector<1x1x32xbf16> to vector<1x32xbf16>
    %2 = arith.extf %1 : vector<1x32xbf16> to vector<1x32xf32>
    %c0_2 = arith.constant 0 : index
    %c0_3 = arith.constant 0 : index
    %c0_4 = arith.constant 0 : index
    %3 = vector.load %arg10[%c0_2, %c0_3, %c0_4] : memref<1x1x32xbf16, #tpu.memory_space<vmem>>, vector<1x1x32xbf16>
    %4 = vector.shape_cast %3 : vector<1x1x32xbf16> to vector<1x32xbf16>
    %5 = arith.extf %4 : vector<1x32xbf16> to vector<1x32xf32>
    %6 = arith.addf %2, %5 : vector<1x32xf32>
    %c0_5 = arith.constant 0 : index
    %c0_6 = arith.constant 0 : index
    %c0_7 = arith.constant 0 : index
    %7 = vector.load %arg3[%c0_5, %c0_6, %c0_7] : memref<1x1x32xbf16, #tpu.memory_space<vmem>>, vector<1x1x32xbf16>
    %8 = vector.shape_cast %7 : vector<1x1x32xbf16> to vector<1x32xbf16>
    %9 = arith.extf %8 : vector<1x32xbf16> to vector<1x32xf32>
    %c0_8 = arith.constant 0 : index
    %c0_9 = arith.constant 0 : index
    %c0_10 = arith.constant 0 : index
    %10 = vector.load %arg11[%c0_8, %c0_9, %c0_10] : memref<1x1x32xbf16, #tpu.memory_space<vmem>>, vector<1x1x32xbf16>
    %11 = vector.shape_cast %10 : vector<1x1x32xbf16> to vector<1x32xbf16>
    %12 = arith.extf %11 : vector<1x32xbf16> to vector<1x32xf32>
    %13 = arith.addf %9, %12 : vector<1x32xf32>
    %c0_11 = arith.constant 0 : index
    %c0_12 = arith.constant 0 : index
    %c0_13 = arith.constant 0 : index
    %14 = vector.load %arg4[%c0_11, %c0_12, %c0_13] : memref<1x1x32xbf16, #tpu.memory_space<vmem>>, vector<1x1x32xbf16>
    %15 = vector.shape_cast %14 : vector<1x1x32xbf16> to vector<1x32xbf16>
    %16 = arith.extf %15 : vector<1x32xbf16> to vector<1x32xf32>
    %c0_14 = arith.constant 0 : index
    %c0_15 = arith.constant 0 : index
    %c0_16 = arith.constant 0 : index
    %17 = vector.load %arg12[%c0_14, %c0_15, %c0_16] : memref<1x1x32xbf16, #tpu.memory_space<vmem>>, vector<1x1x32xbf16>
    %18 = vector.shape_cast %17 : vector<1x1x32xbf16> to vector<1x32xbf16>
    %19 = arith.extf %18 : vector<1x32xbf16> to vector<1x32xf32>
    %20 = arith.addf %16, %19 : vector<1x32xf32>
    %c0_17 = arith.constant 0 : index
    %c0_18 = arith.constant 0 : index
    %c0_19 = arith.constant 0 : index
    %21 = vector.load %arg5[%c0_17, %c0_18, %c0_19] : memref<1x1x32xbf16, #tpu.memory_space<vmem>>, vector<1x1x32xbf16>
    %22 = vector.shape_cast %21 : vector<1x1x32xbf16> to vector<1x32xbf16>
    %23 = arith.extf %22 : vector<1x32xbf16> to vector<1x32xf32>
    %c0_20 = arith.constant 0 : index
    %c0_21 = arith.constant 0 : index
    %c0_22 = arith.constant 0 : index
    %24 = vector.load %arg13[%c0_20, %c0_21, %c0_22] : memref<1x1x32xbf16, #tpu.memory_space<vmem>>, vector<1x1x32xbf16>
    %25 = vector.shape_cast %24 : vector<1x1x32xbf16> to vector<1x32xbf16>
    %26 = arith.extf %25 : vector<1x32xbf16> to vector<1x32xf32>
    %27 = arith.addf %23, %26 : vector<1x32xf32>
    %c0_23 = arith.constant 0 : index
    %c0_24 = arith.constant 0 : index
    %c0_25 = arith.constant 0 : index
    %28 = vector.load %arg6[%c0_23, %c0_24, %c0_25] : memref<1x1x32xbf16, #tpu.memory_space<vmem>>, vector<1x1x32xbf16>
    %29 = vector.shape_cast %28 : vector<1x1x32xbf16> to vector<1x32xbf16>
    %30 = arith.extf %29 : vector<1x32xbf16> to vector<1x32xf32>
    %c0_26 = arith.constant 0 : index
    %c0_27 = arith.constant 0 : index
    %c0_28 = arith.constant 0 : index
    %31 = vector.load %arg14[%c0_26, %c0_27, %c0_28] : memref<1x1x32xbf16, #tpu.memory_space<vmem>>, vector<1x1x32xbf16>
    %32 = vector.shape_cast %31 : vector<1x1x32xbf16> to vector<1x32xbf16>
    %33 = arith.extf %32 : vector<1x32xbf16> to vector<1x32xf32>
    %34 = arith.addf %30, %33 : vector<1x32xf32>
    %c0_29 = arith.constant 0 : index
    %c0_30 = arith.constant 0 : index
    %c0_31 = arith.constant 0 : index
    %35 = vector.load %arg7[%c0_29, %c0_30, %c0_31] : memref<1x1x32xbf16, #tpu.memory_space<vmem>>, vector<1x1x32xbf16>
    %36 = vector.shape_cast %35 : vector<1x1x32xbf16> to vector<1x32xbf16>
    %37 = arith.extf %36 : vector<1x32xbf16> to vector<1x32xf32>
    %c0_32 = arith.constant 0 : index
    %c0_33 = arith.constant 0 : index
    %c0_34 = arith.constant 0 : index
    %38 = vector.load %arg15[%c0_32, %c0_33, %c0_34] : memref<1x1x32xbf16, #tpu.memory_space<vmem>>, vector<1x1x32xbf16>
    %39 = vector.shape_cast %38 : vector<1x1x32xbf16> to vector<1x32xbf16>
    %40 = arith.extf %39 : vector<1x32xbf16> to vector<1x32xf32>
    %41 = arith.addf %37, %40 : vector<1x32xf32>
    %c0_35 = arith.constant 0 : index
    %c0_36 = arith.constant 0 : index
    %c0_37 = arith.constant 0 : index
    %42 = vector.load %arg8[%c0_35, %c0_36, %c0_37] : memref<1x1x32xbf16, #tpu.memory_space<vmem>>, vector<1x1x32xbf16>
    %43 = vector.shape_cast %42 : vector<1x1x32xbf16> to vector<1x32xbf16>
    %44 = arith.extf %43 : vector<1x32xbf16> to vector<1x32xf32>
    %c0_38 = arith.constant 0 : index
    %c0_39 = arith.constant 0 : index
    %c0_40 = arith.constant 0 : index
    %45 = vector.load %arg16[%c0_38, %c0_39, %c0_40] : memref<1x1x32xbf16, #tpu.memory_space<vmem>>, vector<1x1x32xbf16>
    %46 = vector.shape_cast %45 : vector<1x1x32xbf16> to vector<1x32xbf16>
    %47 = arith.extf %46 : vector<1x32xbf16> to vector<1x32xf32>
    %48 = arith.addf %44, %47 : vector<1x32xf32>
    %c0_41 = arith.constant 0 : index
    %c0_42 = arith.constant 0 : index
    %c0_43 = arith.constant 0 : index
    %49 = vector.load %arg9[%c0_41, %c0_42, %c0_43] : memref<1x1x32xbf16, #tpu.memory_space<vmem>>, vector<1x1x32xbf16>
    %50 = vector.shape_cast %49 : vector<1x1x32xbf16> to vector<1x32xbf16>
    %51 = arith.extf %50 : vector<1x32xbf16> to vector<1x32xf32>
    %c0_44 = arith.constant 0 : index
    %c0_45 = arith.constant 0 : index
    %c0_46 = arith.constant 0 : index
    %52 = vector.load %arg17[%c0_44, %c0_45, %c0_46] : memref<1x1x32xbf16, #tpu.memory_space<vmem>>, vector<1x1x32xbf16>
    %53 = vector.shape_cast %52 : vector<1x1x32xbf16> to vector<1x32xbf16>
    %54 = arith.extf %53 : vector<1x32xbf16> to vector<1x32xf32>
    %55 = arith.addf %51, %54 : vector<1x32xf32>
    %56 = tpu.concatenate %6, %13, %20, %27, %34, %41, %48, %55 in 0 : vector<1x32xf32>, vector<1x32xf32>, vector<1x32xf32>, vector<1x32xf32>, vector<1x32xf32>, vector<1x32xf32>, vector<1x32xf32>, vector<1x32xf32> -> vector<8x32xf32>
    %57 = arith.truncf %56 : vector<8x32xf32> to vector<8x32xbf16>
    %c0_47 = arith.constant 0 : index
    %c0_48 = arith.constant 0 : index
    %c0_49 = arith.constant 0 : index
    %58 = vector.load %arg18[%c0_47, %c0_48, %c0_49] : memref<1x8x32xbf16, #tpu.memory_space<vmem>>, vector<1x8x32xbf16>
    %59 = vector.shape_cast %58 : vector<1x8x32xbf16> to vector<8x32xbf16>
    %60 = vector.shape_cast %57 : vector<8x32xbf16> to vector<1x8x32xbf16>
    tpu.vector_store %arg18[%c0_47, %c0_48, %c0_49], %60 {strides = array<i32>} : memref<1x8x32xbf16, #tpu.memory_space<vmem>>, vector<1x8x32xbf16>,
    return
  }
  func.func @transform_0(%arg0: i32, %arg1: memref<16xi32, #tpu.memory_space<smem>>) -> (i32, i32, i32) {
    %c8_i32 = arith.constant 8 : i32
    %0 = arith.muli %arg0, %c8_i32 : i32
    %c0_i32 = arith.constant 0 : i32
    %1 = arith.addi %0, %c0_i32 : i32
    %2 = arith.index_cast %1 : i32 to index
    %3 = memref.load %arg1[%2] : memref<16xi32, #tpu.memory_space<smem>>
    %c0_i32_0 = arith.constant 0 : i32
    %c0_i32_1 = arith.constant 0 : i32
    %c0_i32_2 = arith.constant 0 : i32
    return %3, %c0_i32_0, %c0_i32_1 : i32, i32, i32
  }
  func.func @transform_1(%arg0: i32, %arg1: memref<16xi32, #tpu.memory_space<smem>>) -> (i32, i32, i32) {
    %c8_i32 = arith.constant 8 : i32
    %0 = arith.muli %arg0, %c8_i32 : i32
    %c1_i32 = arith.constant 1 : i32
    %1 = arith.addi %0, %c1_i32 : i32
    %2 = arith.index_cast %1 : i32 to index
    %3 = memref.load %arg1[%2] : memref<16xi32, #tpu.memory_space<smem>>
    %c0_i32 = arith.constant 0 : i32
    %c0_i32_0 = arith.constant 0 : i32
    %c0_i32_1 = arith.constant 0 : i32
    return %3, %c0_i32, %c0_i32_0 : i32, i32, i32
  }
  func.func @transform_2(%arg0: i32, %arg1: memref<16xi32, #tpu.memory_space<smem>>) -> (i32, i32, i32) {
    %c8_i32 = arith.constant 8 : i32
    %0 = arith.muli %arg0, %c8_i32 : i32
    %c2_i32 = arith.constant 2 : i32
    %1 = arith.addi %0, %c2_i32 : i32
    %2 = arith.index_cast %1 : i32 to index
    %3 = memref.load %arg1[%2] : memref<16xi32, #tpu.memory_space<smem>>
    %c0_i32 = arith.constant 0 : i32
    %c0_i32_0 = arith.constant 0 : i32
    %c0_i32_1 = arith.constant 0 : i32
    return %3, %c0_i32, %c0_i32_0 : i32, i32, i32
  }
  func.func @transform_3(%arg0: i32, %arg1: memref<16xi32, #tpu.memory_space<smem>>) -> (i32, i32, i32) {
    %c8_i32 = arith.constant 8 : i32
    %0 = arith.muli %arg0, %c8_i32 : i32
    %c3_i32 = arith.constant 3 : i32
    %1 = arith.addi %0, %c3_i32 : i32
    %2 = arith.index_cast %1 : i32 to index
    %3 = memref.load %arg1[%2] : memref<16xi32, #tpu.memory_space<smem>>
    %c0_i32 = arith.constant 0 : i32
    %c0_i32_0 = arith.constant 0 : i32
    %c0_i32_1 = arith.constant 0 : i32
    return %3, %c0_i32, %c0_i32_0 : i32, i32, i32
  }
  func.func @transform_4(%arg0: i32, %arg1: memref<16xi32, #tpu.memory_space<smem>>) -> (i32, i32, i32) {
    %c8_i32 = arith.constant 8 : i32
    %0 = arith.muli %arg0, %c8_i32 : i32
    %c4_i32 = arith.constant 4 : i32
    %1 = arith.addi %0, %c4_i32 : i32
    %2 = arith.index_cast %1 : i32 to index
    %3 = memref.load %arg1[%2] : memref<16xi32, #tpu.memory_space<smem>>
    %c0_i32 = arith.constant 0 : i32
    %c0_i32_0 = arith.constant 0 : i32
    %c0_i32_1 = arith.constant 0 : i32
    return %3, %c0_i32, %c0_i32_0 : i32, i32, i32
  }
  func.func @transform_5(%arg0: i32, %arg1: memref<16xi32, #tpu.memory_space<smem>>) -> (i32, i32, i32) {
    %c8_i32 = arith.constant 8 : i32
    %0 = arith.muli %arg0, %c8_i32 : i32
    %c5_i32 = arith.constant 5 : i32
    %1 = arith.addi %0, %c5_i32 : i32
    %2 = arith.index_cast %1 : i32 to index
    %3 = memref.load %arg1[%2] : memref<16xi32, #tpu.memory_space<smem>>
    %c0_i32 = arith.constant 0 : i32
    %c0_i32_0 = arith.constant 0 : i32
    %c0_i32_1 = arith.constant 0 : i32
    return %3, %c0_i32, %c0_i32_0 : i32, i32, i32
  }
  func.func @transform_6(%arg0: i32, %arg1: memref<16xi32, #tpu.memory_space<smem>>) -> (i32, i32, i32) {
    %c8_i32 = arith.constant 8 : i32
    %0 = arith.muli %arg0, %c8_i32 : i32
    %c6_i32 = arith.constant 6 : i32
    %1 = arith.addi %0, %c6_i32 : i32
    %2 = arith.index_cast %1 : i32 to index
    %3 = memref.load %arg1[%2] : memref<16xi32, #tpu.memory_space<smem>>
    %c0_i32 = arith.constant 0 : i32
    %c0_i32_0 = arith.constant 0 : i32
    %c0_i32_1 = arith.constant 0 : i32
    return %3, %c0_i32, %c0_i32_0 : i32, i32, i32
  }
  func.func @transform_7(%arg0: i32, %arg1: memref<16xi32, #tpu.memory_space<smem>>) -> (i32, i32, i32) {
    %c8_i32 = arith.constant 8 : i32
    %0 = arith.muli %arg0, %c8_i32 : i32
    %c7_i32 = arith.constant 7 : i32
    %1 = arith.addi %0, %c7_i32 : i32
    %2 = arith.index_cast %1 : i32 to index
    %3 = memref.load %arg1[%2] : memref<16xi32, #tpu.memory_space<smem>>
    %c0_i32 = arith.constant 0 : i32
    %c0_i32_0 = arith.constant 0 : i32
    %c0_i32_1 = arith.constant 0 : i32
    return %3, %c0_i32, %c0_i32_0 : i32, i32, i32
  }
  func.func @transform_8(%arg0: i32, %arg1: memref<16xi32, #tpu.memory_space<smem>>) -> (i32, i32, i32) {
    %c8_i32 = arith.constant 8 : i32
    %0 = arith.muli %arg0, %c8_i32 : i32
    %c0_i32 = arith.constant 0 : i32
    %1 = arith.addi %0, %c0_i32 : i32
    %c8_i32_0 = arith.constant 8 : i32
    %c0_i32_1 = arith.constant 0 : i32
    %2 = arith.cmpi eq, %c8_i32_0, %c0_i32_1 : i32
    %c1_i32 = arith.constant 1 : i32
    %3 = arith.select %2, %c1_i32, %c8_i32_0 : i32
    %4 = arith.remsi %1, %3 : i32
    %c0_i32_2 = arith.constant 0 : i32
    %5 = arith.cmpi ne, %4, %c0_i32_2 : i32
    %c0_i32_3 = arith.constant 0 : i32
    %6 = arith.cmpi slt, %4, %c0_i32_3 : i32
    %c0_i32_4 = arith.constant 0 : i32
    %7 = arith.cmpi slt, %3, %c0_i32_4 : i32
    %8 = arith.xori %6, %7 : i1
    %9 = arith.andi %8, %5 : i1
    %10 = arith.addi %4, %3 : i32
    %11 = arith.select %9, %10, %4 : i32
    %c2_i32 = arith.constant 2 : i32
    %12 = arith.addi %c2_i32, %11 : i32
    %c0_i32_5 = arith.constant 0 : i32
    %c0_i32_6 = arith.constant 0 : i32
    %c0_i32_7 = arith.constant 0 : i32
    return %12, %c0_i32_5, %c0_i32_6 : i32, i32, i32
  }
  func.func @transform_9(%arg0: i32, %arg1: memref<16xi32, #tpu.memory_space<smem>>) -> (i32, i32, i32) {
    %c8_i32 = arith.constant 8 : i32
    %0 = arith.muli %arg0, %c8_i32 : i32
    %c1_i32 = arith.constant 1 : i32
    %1 = arith.addi %0, %c1_i32 : i32
    %c8_i32_0 = arith.constant 8 : i32
    %c0_i32 = arith.constant 0 : i32
    %2 = arith.cmpi eq, %c8_i32_0, %c0_i32 : i32
    %c1_i32_1 = arith.constant 1 : i32
    %3 = arith.select %2, %c1_i32_1, %c8_i32_0 : i32
    %4 = arith.remsi %1, %3 : i32
    %c0_i32_2 = arith.constant 0 : i32
    %5 = arith.cmpi ne, %4, %c0_i32_2 : i32
    %c0_i32_3 = arith.constant 0 : i32
    %6 = arith.cmpi slt, %4, %c0_i32_3 : i32
    %c0_i32_4 = arith.constant 0 : i32
    %7 = arith.cmpi slt, %3, %c0_i32_4 : i32
    %8 = arith.xori %6, %7 : i1
    %9 = arith.andi %8, %5 : i1
    %10 = arith.addi %4, %3 : i32
    %11 = arith.select %9, %10, %4 : i32
    %c2_i32 = arith.constant 2 : i32
    %12 = arith.addi %c2_i32, %11 : i32
    %c0_i32_5 = arith.constant 0 : i32
    %c0_i32_6 = arith.constant 0 : i32
    %c0_i32_7 = arith.constant 0 : i32
    return %12, %c0_i32_5, %c0_i32_6 : i32, i32, i32
  }
  func.func @transform_10(%arg0: i32, %arg1: memref<16xi32, #tpu.memory_space<smem>>) -> (i32, i32, i32) {
    %c8_i32 = arith.constant 8 : i32
    %0 = arith.muli %arg0, %c8_i32 : i32
    %c2_i32 = arith.constant 2 : i32
    %1 = arith.addi %0, %c2_i32 : i32
    %c8_i32_0 = arith.constant 8 : i32
    %c0_i32 = arith.constant 0 : i32
    %2 = arith.cmpi eq, %c8_i32_0, %c0_i32 : i32
    %c1_i32 = arith.constant 1 : i32
    %3 = arith.select %2, %c1_i32, %c8_i32_0 : i32
    %4 = arith.remsi %1, %3 : i32
    %c0_i32_1 = arith.constant 0 : i32
    %5 = arith.cmpi ne, %4, %c0_i32_1 : i32
    %c0_i32_2 = arith.constant 0 : i32
    %6 = arith.cmpi slt, %4, %c0_i32_2 : i32
    %c0_i32_3 = arith.constant 0 : i32
    %7 = arith.cmpi slt, %3, %c0_i32_3 : i32
    %8 = arith.xori %6, %7 : i1
    %9 = arith.andi %8, %5 : i1
    %10 = arith.addi %4, %3 : i32
    %11 = arith.select %9, %10, %4 : i32
    %c2_i32_4 = arith.constant 2 : i32
    %12 = arith.addi %c2_i32_4, %11 : i32
    %c0_i32_5 = arith.constant 0 : i32
    %c0_i32_6 = arith.constant 0 : i32
    %c0_i32_7 = arith.constant 0 : i32
    return %12, %c0_i32_5, %c0_i32_6 : i32, i32, i32
  }
  func.func @transform_11(%arg0: i32, %arg1: memref<16xi32, #tpu.memory_space<smem>>) -> (i32, i32, i32) {
    %c8_i32 = arith.constant 8 : i32
    %0 = arith.muli %arg0, %c8_i32 : i32
    %c3_i32 = arith.constant 3 : i32
    %1 = arith.addi %0, %c3_i32 : i32
    %c8_i32_0 = arith.constant 8 : i32
    %c0_i32 = arith.constant 0 : i32
    %2 = arith.cmpi eq, %c8_i32_0, %c0_i32 : i32
    %c1_i32 = arith.constant 1 : i32
    %3 = arith.select %2, %c1_i32, %c8_i32_0 : i32
    %4 = arith.remsi %1, %3 : i32
    %c0_i32_1 = arith.constant 0 : i32
    %5 = arith.cmpi ne, %4, %c0_i32_1 : i32
    %c0_i32_2 = arith.constant 0 : i32
    %6 = arith.cmpi slt, %4, %c0_i32_2 : i32
    %c0_i32_3 = arith.constant 0 : i32
    %7 = arith.cmpi slt, %3, %c0_i32_3 : i32
    %8 = arith.xori %6, %7 : i1
    %9 = arith.andi %8, %5 : i1
    %10 = arith.addi %4, %3 : i32
    %11 = arith.select %9, %10, %4 : i32
    %c2_i32 = arith.constant 2 : i32
    %12 = arith.addi %c2_i32, %11 : i32
    %c0_i32_4 = arith.constant 0 : i32
    %c0_i32_5 = arith.constant 0 : i32
    %c0_i32_6 = arith.constant 0 : i32
    return %12, %c0_i32_4, %c0_i32_5 : i32, i32, i32
  }
  func.func @transform_12(%arg0: i32, %arg1: memref<16xi32, #tpu.memory_space<smem>>) -> (i32, i32, i32) {
    %c8_i32 = arith.constant 8 : i32
    %0 = arith.muli %arg0, %c8_i32 : i32
    %c4_i32 = arith.constant 4 : i32
    %1 = arith.addi %0, %c4_i32 : i32
    %c8_i32_0 = arith.constant 8 : i32
    %c0_i32 = arith.constant 0 : i32
    %2 = arith.cmpi eq, %c8_i32_0, %c0_i32 : i32
    %c1_i32 = arith.constant 1 : i32
    %3 = arith.select %2, %c1_i32, %c8_i32_0 : i32
    %4 = arith.remsi %1, %3 : i32
    %c0_i32_1 = arith.constant 0 : i32
    %5 = arith.cmpi ne, %4, %c0_i32_1 : i32
    %c0_i32_2 = arith.constant 0 : i32
    %6 = arith.cmpi slt, %4, %c0_i32_2 : i32
    %c0_i32_3 = arith.constant 0 : i32
    %7 = arith.cmpi slt, %3, %c0_i32_3 : i32
    %8 = arith.xori %6, %7 : i1
    %9 = arith.andi %8, %5 : i1
    %10 = arith.addi %4, %3 : i32
    %11 = arith.select %9, %10, %4 : i32
    %c2_i32 = arith.constant 2 : i32
    %12 = arith.addi %c2_i32, %11 : i32
    %c0_i32_4 = arith.constant 0 : i32
    %c0_i32_5 = arith.constant 0 : i32
    %c0_i32_6 = arith.constant 0 : i32
    return %12, %c0_i32_4, %c0_i32_5 : i32, i32, i32
  }
  func.func @transform_13(%arg0: i32, %arg1: memref<16xi32, #tpu.memory_space<smem>>) -> (i32, i32, i32) {
    %c8_i32 = arith.constant 8 : i32
    %0 = arith.muli %arg0, %c8_i32 : i32
    %c5_i32 = arith.constant 5 : i32
    %1 = arith.addi %0, %c5_i32 : i32
    %c8_i32_0 = arith.constant 8 : i32
    %c0_i32 = arith.constant 0 : i32
    %2 = arith.cmpi eq, %c8_i32_0, %c0_i32 : i32
    %c1_i32 = arith.constant 1 : i32
    %3 = arith.select %2, %c1_i32, %c8_i32_0 : i32
    %4 = arith.remsi %1, %3 : i32
    %c0_i32_1 = arith.constant 0 : i32
    %5 = arith.cmpi ne, %4, %c0_i32_1 : i32
    %c0_i32_2 = arith.constant 0 : i32
    %6 = arith.cmpi slt, %4, %c0_i32_2 : i32
    %c0_i32_3 = arith.constant 0 : i32
    %7 = arith.cmpi slt, %3, %c0_i32_3 : i32
    %8 = arith.xori %6, %7 : i1
    %9 = arith.andi %8, %5 : i1
    %10 = arith.addi %4, %3 : i32
    %11 = arith.select %9, %10, %4 : i32
    %c2_i32 = arith.constant 2 : i32
    %12 = arith.addi %c2_i32, %11 : i32
    %c0_i32_4 = arith.constant 0 : i32
    %c0_i32_5 = arith.constant 0 : i32
    %c0_i32_6 = arith.constant 0 : i32
    return %12, %c0_i32_4, %c0_i32_5 : i32, i32, i32
  }
  func.func @transform_14(%arg0: i32, %arg1: memref<16xi32, #tpu.memory_space<smem>>) -> (i32, i32, i32) {
    %c8_i32 = arith.constant 8 : i32
    %0 = arith.muli %arg0, %c8_i32 : i32
    %c6_i32 = arith.constant 6 : i32
    %1 = arith.addi %0, %c6_i32 : i32
    %c8_i32_0 = arith.constant 8 : i32
    %c0_i32 = arith.constant 0 : i32
    %2 = arith.cmpi eq, %c8_i32_0, %c0_i32 : i32
    %c1_i32 = arith.constant 1 : i32
    %3 = arith.select %2, %c1_i32, %c8_i32_0 : i32
    %4 = arith.remsi %1, %3 : i32
    %c0_i32_1 = arith.constant 0 : i32
    %5 = arith.cmpi ne, %4, %c0_i32_1 : i32
    %c0_i32_2 = arith.constant 0 : i32
    %6 = arith.cmpi slt, %4, %c0_i32_2 : i32
    %c0_i32_3 = arith.constant 0 : i32
    %7 = arith.cmpi slt, %3, %c0_i32_3 : i32
    %8 = arith.xori %6, %7 : i1
    %9 = arith.andi %8, %5 : i1
    %10 = arith.addi %4, %3 : i32
    %11 = arith.select %9, %10, %4 : i32
    %c2_i32 = arith.constant 2 : i32
    %12 = arith.addi %c2_i32, %11 : i32
    %c0_i32_4 = arith.constant 0 : i32
    %c0_i32_5 = arith.constant 0 : i32
    %c0_i32_6 = arith.constant 0 : i32
    return %12, %c0_i32_4, %c0_i32_5 : i32, i32, i32
  }
  func.func @transform_15(%arg0: i32, %arg1: memref<16xi32, #tpu.memory_space<smem>>) -> (i32, i32, i32) {
    %c8_i32 = arith.constant 8 : i32
    %0 = arith.muli %arg0, %c8_i32 : i32
    %c7_i32 = arith.constant 7 : i32
    %1 = arith.addi %0, %c7_i32 : i32
    %c8_i32_0 = arith.constant 8 : i32
    %c0_i32 = arith.constant 0 : i32
    %2 = arith.cmpi eq, %c8_i32_0, %c0_i32 : i32
    %c1_i32 = arith.constant 1 : i32
    %3 = arith.select %2, %c1_i32, %c8_i32_0 : i32
    %4 = arith.remsi %1, %3 : i32
    %c0_i32_1 = arith.constant 0 : i32
    %5 = arith.cmpi ne, %4, %c0_i32_1 : i32
    %c0_i32_2 = arith.constant 0 : i32
    %6 = arith.cmpi slt, %4, %c0_i32_2 : i32
    %c0_i32_3 = arith.constant 0 : i32
    %7 = arith.cmpi slt, %3, %c0_i32_3 : i32
    %8 = arith.xori %6, %7 : i1
    %9 = arith.andi %8, %5 : i1
    %10 = arith.addi %4, %3 : i32
    %11 = arith.select %9, %10, %4 : i32
    %c2_i32 = arith.constant 2 : i32
    %12 = arith.addi %c2_i32, %11 : i32
    %c0_i32_4 = arith.constant 0 : i32
    %c0_i32_5 = arith.constant 0 : i32
    %c0_i32_6 = arith.constant 0 : i32
    return %12, %c0_i32_4, %c0_i32_5 : i32, i32, i32
  }
  func.func @transform_16(%arg0: i32, %arg1: memref<16xi32, #tpu.memory_space<smem>>) -> (i32, i32, i32) {
    %c0_i32 = arith.constant 0 : i32
    %c0_i32_0 = arith.constant 0 : i32
    %c0_i32_1 = arith.constant 0 : i32
    return %arg0, %c0_i32, %c0_i32_0 : i32, i32, i32
  }
}

module attributes {stable_mosaic.version = 11 : i64} {
  func.func @attn_kernel(%arg0: i32, %arg1: memref<1x8x32xbf16, #tpu.memory_space<vmem>>, %arg2: memref<1x32xf32, #tpu.memory_space<vmem>>, %arg3: memref<1x32xf32, #tpu.memory_space<vmem>>, %arg4: memref<32x96xbf16, #tpu.memory_space<vmem>>, %arg5: memref<1x96xf32, #tpu.memory_space<vmem>>, %arg6: memref<32x32xbf16, #tpu.memory_space<vmem>>, %arg7: memref<1x32xf32, #tpu.memory_space<vmem>>, %arg8: memref<1x8x32xbf16, #tpu.memory_space<vmem>>) attributes {dimension_semantics = [#tpu.dimension_semantics<parallel>], iteration_bounds = array<i64: 2>, scalar_prefetch = 0 : i64, scratch_operands = 0 : i64, tpu.core_type = #tpu.core_type<tc>, window_params = [{transform_indices = @transform_0, window_bounds = array<i64: 1, 8, 32>}, {pipeline_mode = #tpu.pipeline_mode<synchronous>, transform_indices = @transform_1, window_bounds = array<i64: 1, 32>}, {pipeline_mode = #tpu.pipeline_mode<synchronous>, transform_indices = @transform_2, window_bounds = array<i64: 1, 32>}, {pipeline_mode = #tpu.pipeline_mode<synchronous>, transform_indices = @transform_3, window_bounds = array<i64: 32, 96>}, {pipeline_mode = #tpu.pipeline_mode<synchronous>, transform_indices = @transform_4, window_bounds = array<i64: 1, 96>}, {pipeline_mode = #tpu.pipeline_mode<synchronous>, transform_indices = @transform_5, window_bounds = array<i64: 32, 32>}, {pipeline_mode = #tpu.pipeline_mode<synchronous>, transform_indices = @transform_6, window_bounds = array<i64: 1, 32>}, {transform_indices = @transform_7, window_bounds = array<i64: 1, 8, 32>}]} {
    %c0 = arith.constant 0 : index
    %c0_0 = arith.constant 0 : index
    %c0_1 = arith.constant 0 : index
    %0 = vector.load %arg1[%c0, %c0_0, %c0_1] : memref<1x8x32xbf16, #tpu.memory_space<vmem>>, vector<1x8x32xbf16>
    %1 = vector.shape_cast %0 : vector<1x8x32xbf16> to vector<8x32xbf16>
    %2 = arith.extf %1 : vector<8x32xbf16> to vector<8x32xf32>
    %c0_2 = arith.constant 0 : index
    %c0_3 = arith.constant 0 : index
    %3 = vector.load %arg2[%c0_2, %c0_3] : memref<1x32xf32, #tpu.memory_space<vmem>>, vector<1x32xf32>
    %c0_4 = arith.constant 0 : index
    %c0_5 = arith.constant 0 : index
    %4 = vector.load %arg3[%c0_4, %c0_5] : memref<1x32xf32, #tpu.memory_space<vmem>>, vector<1x32xf32>
    %cst = arith.constant dense<0.000000e+00> : vector<8xf32>
    %5 = vector.multi_reduction <add>, %2, %cst [1] : vector<8x32xf32> to vector<8xf32>
    %6 = vector.shape_cast %5 : vector<8xf32> to vector<8x1xf32>
    %cst_6 = arith.constant 3.200000e+01 : f32
    %7 = vector.broadcast %cst_6 : f32 to vector<8x1xf32>
    %8 = arith.divf %6, %7 : vector<8x1xf32>
    %9 = vector.broadcast %8 : vector<8x1xf32> to vector<8x32xf32>
    %10 = arith.subf %2, %9 : vector<8x32xf32>
    %11 = arith.mulf %10, %10 : vector<8x32xf32>
    %cst_7 = arith.constant dense<0.000000e+00> : vector<8xf32>
    %12 = vector.multi_reduction <add>, %11, %cst_7 [1] : vector<8x32xf32> to vector<8xf32>
    %13 = vector.shape_cast %12 : vector<8xf32> to vector<8x1xf32>
    %cst_8 = arith.constant 3.200000e+01 : f32
    %14 = vector.broadcast %cst_8 : f32 to vector<8x1xf32>
    %15 = arith.divf %13, %14 : vector<8x1xf32>
    %16 = vector.broadcast %8 : vector<8x1xf32> to vector<8x32xf32>
    %17 = arith.subf %2, %16 : vector<8x32xf32>
    %cst_9 = arith.constant 9.99999974E-6 : f32
    %18 = vector.broadcast %cst_9 : f32 to vector<8x1xf32>
    %19 = arith.addf %15, %18 : vector<8x1xf32>
    %20 = math.rsqrt %19 : vector<8x1xf32>
    %21 = vector.broadcast %20 : vector<8x1xf32> to vector<8x32xf32>
    %22 = arith.mulf %17, %21 : vector<8x32xf32>
    %23 = vector.broadcast %3 : vector<1x32xf32> to vector<8x32xf32>
    %24 = arith.mulf %22, %23 : vector<8x32xf32>
    %25 = vector.broadcast %4 : vector<1x32xf32> to vector<8x32xf32>
    %26 = arith.addf %24, %25 : vector<8x32xf32>
    %27 = arith.truncf %26 : vector<8x32xf32> to vector<8x32xbf16>
    %c0_10 = arith.constant 0 : index
    %c0_11 = arith.constant 0 : index
    %28 = vector.load %arg4[%c0_10, %c0_11] : memref<32x96xbf16, #tpu.memory_space<vmem>>, vector<32x96xbf16>
    %cst_12 = arith.constant dense<0.000000e+00> : vector<8x96xf32>
    %29 = tpu.matmul %27, %28, %cst_12 {dimension_numbers = #tpu.dot_dimension_numbers<[1], [0], [0], [1], [0, 0, 1, 1], [], []>} : vector<8x32xbf16>, vector<32x96xbf16>, vector<8x96xf32> -> vector<8x96xf32>
    %c0_13 = arith.constant 0 : index
    %c0_14 = arith.constant 0 : index
    %30 = vector.load %arg5[%c0_13, %c0_14] : memref<1x96xf32, #tpu.memory_space<vmem>>, vector<1x96xf32>
    %31 = vector.broadcast %30 : vector<1x96xf32> to vector<8x96xf32>
    %32 = arith.addf %29, %31 : vector<8x96xf32>
    %33 = vector.extract_strided_slice %32 {offsets = [0, 0], sizes = [8, 32], strides = [1, 1]} : vector<8x96xf32> to vector<8x32xf32>
    %34 = vector.extract_strided_slice %32 {offsets = [0, 32], sizes = [8, 32], strides = [1, 1]} : vector<8x96xf32> to vector<8x32xf32>
    %35 = vector.extract_strided_slice %32 {offsets = [0, 64], sizes = [8, 32], strides = [1, 1]} : vector<8x96xf32> to vector<8x32xf32>
    %36 = tpu.iota {dimensions = array<i32: 0>} : vector<8x8xi32>
    %37 = tpu.iota {dimensions = array<i32: 1>} : vector<8x8xi32>
    %38 = arith.cmpi sge, %36, %37 : vector<8x8xi32>
    %39 = vector.extract_strided_slice %33 {offsets = [0, 0], sizes = [8, 16], strides = [1, 1]} : vector<8x32xf32> to vector<8x16xf32>
    %40 = arith.truncf %39 : vector<8x16xf32> to vector<8x16xbf16>
    %41 = vector.extract_strided_slice %34 {offsets = [0, 0], sizes = [8, 16], strides = [1, 1]} : vector<8x32xf32> to vector<8x16xf32>
    %42 = arith.truncf %41 : vector<8x16xf32> to vector<8x16xbf16>
    %43 = vector.extract_strided_slice %35 {offsets = [0, 0], sizes = [8, 16], strides = [1, 1]} : vector<8x32xf32> to vector<8x16xf32>
    %44 = arith.truncf %43 : vector<8x16xf32> to vector<8x16xbf16>
    "tpu.trace_start"() <{level = 10 : i32, message = "qd,kd->qk"}> : () -> ()
    %cst_15 = arith.constant dense<0.000000e+00> : vector<8x8xf32>
    %45 = tpu.matmul %40, %42, %cst_15 {dimension_numbers = #tpu.dot_dimension_numbers<[1], [1], [0], [0], [0, 0, 1, 0], [], []>} : vector<8x16xbf16>, vector<8x16xbf16>, vector<8x8xf32> -> vector<8x8xf32>
    %cst_16 = arith.constant 0xFF800000 : f32
    "tpu.trace_stop"() : () -> ()
    %46 = vector.broadcast %cst_16 : f32 to vector<8x8xf32>
    %47 = arith.select %38, %45, %46 : vector<8x8xi1>, vector<8x8xf32>
    %cst_17 = arith.constant dense<0xFF800000> : vector<8xf32>
    %48 = vector.multi_reduction <maximumf>, %47, %cst_17 [1] : vector<8x8xf32> to vector<8xf32>
    %49 = vector.shape_cast %48 : vector<8xf32> to vector<8x1xf32>
    %50 = vector.broadcast %49 : vector<8x1xf32> to vector<8x8xf32>
    %51 = arith.subf %47, %50 : vector<8x8xf32>
    %52 = math.exp %51 : vector<8x8xf32>
    %cst_18 = arith.constant dense<0.000000e+00> : vector<8xf32>
    %53 = vector.multi_reduction <add>, %52, %cst_18 [1] : vector<8x8xf32> to vector<8xf32>
    %54 = vector.shape_cast %53 : vector<8xf32> to vector<8x1xf32>
    %55 = tpu.reciprocal %54 {approx = true} : vector<8x1xf32> -> vector<8x1xf32>
    %56 = arith.truncf %52 : vector<8x8xf32> to vector<8x8xbf16>
    %cst_19 = arith.constant dense<0.000000e+00> : vector<8x16xf32>
    %57 = tpu.matmul %56, %44, %cst_19 {dimension_numbers = #tpu.dot_dimension_numbers<[1], [0], [0], [1], [0, 0, 1, 1], [], []>} : vector<8x8xbf16>, vector<8x16xbf16>, vector<8x16xf32> -> vector<8x16xf32>
    %58 = vector.broadcast %55 : vector<8x1xf32> to vector<8x16xf32>
    %59 = arith.mulf %57, %58 : vector<8x16xf32>
    %60 = vector.extract_strided_slice %33 {offsets = [0, 16], sizes = [8, 16], strides = [1, 1]} : vector<8x32xf32> to vector<8x16xf32>
    %61 = arith.truncf %60 : vector<8x16xf32> to vector<8x16xbf16>
    %62 = vector.extract_strided_slice %34 {offsets = [0, 16], sizes = [8, 16], strides = [1, 1]} : vector<8x32xf32> to vector<8x16xf32>
    %63 = arith.truncf %62 : vector<8x16xf32> to vector<8x16xbf16>
    %64 = vector.extract_strided_slice %35 {offsets = [0, 16], sizes = [8, 16], strides = [1, 1]} : vector<8x32xf32> to vector<8x16xf32>
    %65 = arith.truncf %64 : vector<8x16xf32> to vector<8x16xbf16>
    "tpu.trace_start"() <{level = 10 : i32, message = "qd,kd->qk"}> : () -> ()
    %cst_20 = arith.constant dense<0.000000e+00> : vector<8x8xf32>
    %66 = tpu.matmul %61, %63, %cst_20 {dimension_numbers = #tpu.dot_dimension_numbers<[1], [1], [0], [0], [0, 0, 1, 0], [], []>} : vector<8x16xbf16>, vector<8x16xbf16>, vector<8x8xf32> -> vector<8x8xf32>
    %cst_21 = arith.constant 0xFF800000 : f32
    "tpu.trace_stop"() : () -> ()
    %67 = vector.broadcast %cst_21 : f32 to vector<8x8xf32>
    %68 = arith.select %38, %66, %67 : vector<8x8xi1>, vector<8x8xf32>
    %cst_22 = arith.constant dense<0xFF800000> : vector<8xf32>
    %69 = vector.multi_reduction <maximumf>, %68, %cst_22 [1] : vector<8x8xf32> to vector<8xf32>
    %70 = vector.shape_cast %69 : vector<8xf32> to vector<8x1xf32>
    %71 = vector.broadcast %70 : vector<8x1xf32> to vector<8x8xf32>
    %72 = arith.subf %68, %71 : vector<8x8xf32>
    %73 = math.exp %72 : vector<8x8xf32>
    %cst_23 = arith.constant dense<0.000000e+00> : vector<8xf32>
    %74 = vector.multi_reduction <add>, %73, %cst_23 [1] : vector<8x8xf32> to vector<8xf32>
    %75 = vector.shape_cast %74 : vector<8xf32> to vector<8x1xf32>
    %76 = tpu.reciprocal %75 {approx = true} : vector<8x1xf32> -> vector<8x1xf32>
    %77 = arith.truncf %73 : vector<8x8xf32> to vector<8x8xbf16>
    %cst_24 = arith.constant dense<0.000000e+00> : vector<8x16xf32>
    %78 = tpu.matmul %77, %65, %cst_24 {dimension_numbers = #tpu.dot_dimension_numbers<[1], [0], [0], [1], [0, 0, 1, 1], [], []>} : vector<8x8xbf16>, vector<8x16xbf16>, vector<8x16xf32> -> vector<8x16xf32>
    %79 = vector.broadcast %76 : vector<8x1xf32> to vector<8x16xf32>
    %80 = arith.mulf %78, %79 : vector<8x16xf32>
    %81 = tpu.concatenate %59, %80 in 1 : vector<8x16xf32>, vector<8x16xf32> -> vector<8x32xf32>
    %82 = arith.truncf %81 : vector<8x32xf32> to vector<8x32xbf16>
    %c0_25 = arith.constant 0 : index
    %c0_26 = arith.constant 0 : index
    %83 = vector.load %arg6[%c0_25, %c0_26] : memref<32x32xbf16, #tpu.memory_space<vmem>>, vector<32x32xbf16>
    %cst_27 = arith.constant dense<0.000000e+00> : vector<8x32xf32>
    %84 = tpu.matmul %82, %83, %cst_27 {dimension_numbers = #tpu.dot_dimension_numbers<[1], [0], [0], [1], [0, 0, 1, 1], [], []>} : vector<8x32xbf16>, vector<32x32xbf16>, vector<8x32xf32> -> vector<8x32xf32>
    %c0_28 = arith.constant 0 : index
    %c0_29 = arith.constant 0 : index
    %85 = vector.load %arg7[%c0_28, %c0_29] : memref<1x32xf32, #tpu.memory_space<vmem>>, vector<1x32xf32>
    %86 = vector.broadcast %85 : vector<1x32xf32> to vector<8x32xf32>
    %87 = arith.addf %84, %86 : vector<8x32xf32>
    %88 = arith.addf %2, %87 : vector<8x32xf32>
    %89 = arith.truncf %88 : vector<8x32xf32> to vector<8x32xbf16>
    %c0_30 = arith.constant 0 : index
    %c0_31 = arith.constant 0 : index
    %c0_32 = arith.constant 0 : index
    %90 = vector.load %arg8[%c0_30, %c0_31, %c0_32] : memref<1x8x32xbf16, #tpu.memory_space<vmem>>, vector<1x8x32xbf16>
    %91 = vector.shape_cast %90 : vector<1x8x32xbf16> to vector<8x32xbf16>
    %92 = vector.shape_cast %89 : vector<8x32xbf16> to vector<1x8x32xbf16>
    tpu.vector_store %arg8[%c0_30, %c0_31, %c0_32], %92 {strides = array<i32>} : memref<1x8x32xbf16, #tpu.memory_space<vmem>>, vector<1x8x32xbf16>,
    return
  }
  func.func @transform_0(%arg0: i32) -> (i32, i32, i32) {
    %c0_i32 = arith.constant 0 : i32
    %c0_i32_0 = arith.constant 0 : i32
    %c0_i32_1 = arith.constant 0 : i32
    return %arg0, %c0_i32, %c0_i32_0 : i32, i32, i32
  }
  func.func @transform_1(%arg0: i32) -> (i32, i32) {
    %c0_i32 = arith.constant 0 : i32
    %c0_i32_0 = arith.constant 0 : i32
    %c0_i32_1 = arith.constant 0 : i32
    return %c0_i32, %c0_i32_0 : i32, i32
  }
  func.func @transform_2(%arg0: i32) -> (i32, i32) {
    %c0_i32 = arith.constant 0 : i32
    %c0_i32_0 = arith.constant 0 : i32
    %c0_i32_1 = arith.constant 0 : i32
    return %c0_i32, %c0_i32_0 : i32, i32
  }
  func.func @transform_3(%arg0: i32) -> (i32, i32) {
    %c0_i32 = arith.constant 0 : i32
    %c0_i32_0 = arith.constant 0 : i32
    %c0_i32_1 = arith.constant 0 : i32
    return %c0_i32, %c0_i32_0 : i32, i32
  }
  func.func @transform_4(%arg0: i32) -> (i32, i32) {
    %c0_i32 = arith.constant 0 : i32
    %c0_i32_0 = arith.constant 0 : i32
    %c0_i32_1 = arith.constant 0 : i32
    return %c0_i32, %c0_i32_0 : i32, i32
  }
  func.func @transform_5(%arg0: i32) -> (i32, i32) {
    %c0_i32 = arith.constant 0 : i32
    %c0_i32_0 = arith.constant 0 : i32
    %c0_i32_1 = arith.constant 0 : i32
    return %c0_i32, %c0_i32_0 : i32, i32
  }
  func.func @transform_6(%arg0: i32) -> (i32, i32) {
    %c0_i32 = arith.constant 0 : i32
    %c0_i32_0 = arith.constant 0 : i32
    %c0_i32_1 = arith.constant 0 : i32
    return %c0_i32, %c0_i32_0 : i32, i32
  }
  func.func @transform_7(%arg0: i32) -> (i32, i32, i32) {
    %c0_i32 = arith.constant 0 : i32
    %c0_i32_0 = arith.constant 0 : i32
    %c0_i32_1 = arith.constant 0 : i32
    return %arg0, %c0_i32, %c0_i32_0 : i32, i32, i32
  }
}

module attributes {stable_mosaic.version = 11 : i64} {
  func.func @mlp_kernel(%arg0: i32, %arg1: i32, %arg2: i32, %arg3: memref<1x8x32xbf16, #tpu.memory_space<vmem>>, %arg4: memref<1x32xf32, #tpu.memory_space<vmem>>, %arg5: memref<1x32xf32, #tpu.memory_space<vmem>>, %arg6: memref<32x128xbf16, #tpu.memory_space<vmem>>, %arg7: memref<1x128xf32, #tpu.memory_space<vmem>>, %arg8: memref<128x32xbf16, #tpu.memory_space<vmem>>, %arg9: memref<1x32xf32, #tpu.memory_space<vmem>>, %arg10: memref<1x8x32xbf16, #tpu.memory_space<vmem>>, %arg11: memref<8x32xbf16, #tpu.memory_space<vmem>>, %arg12: memref<8x32xf32, #tpu.memory_space<vmem>>) attributes {dimension_semantics = [#tpu.dimension_semantics<parallel>, #tpu.dimension_semantics<parallel>, #tpu.dimension_semantics<arbitrary>], iteration_bounds = array<i64: 2, 1, 1>, scalar_prefetch = 0 : i64, scratch_operands = 2 : i64, tpu.core_type = #tpu.core_type<tc>, window_params = [{transform_indices = @transform_0, window_bounds = array<i64: 1, 8, 32>}, {pipeline_mode = #tpu.pipeline_mode<synchronous>, transform_indices = @transform_1, window_bounds = array<i64: 1, 32>}, {pipeline_mode = #tpu.pipeline_mode<synchronous>, transform_indices = @transform_2, window_bounds = array<i64: 1, 32>}, {transform_indices = @transform_3, window_bounds = array<i64: 32, 128>}, {transform_indices = @transform_4, window_bounds = array<i64: 1, 128>}, {transform_indices = @transform_5, window_bounds = array<i64: 128, 32>}, {pipeline_mode = #tpu.pipeline_mode<synchronous>, transform_indices = @transform_6, window_bounds = array<i64: 1, 32>}, {transform_indices = @transform_7, window_bounds = array<i64: 1, 8, 32>}]} {
    %c0_i32 = arith.constant 0 : i32
    %0 = arith.cmpi eq, %arg2, %c0_i32 : i32
    %1 = arith.extui %0 : i1 to i32
    %c0_i32_0 = arith.constant 0 : i32
    %2 = arith.cmpi ne, %1, %c0_i32_0 : i32
    scf.if %2 {
      %c0_16 = arith.constant 0 : index
      %c0_17 = arith.constant 0 : index
      %c0_18 = arith.constant 0 : index
      %20 = vector.load %arg3[%c0_16, %c0_17, %c0_18] : memref<1x8x32xbf16, #tpu.memory_space<vmem>>, vector<1x8x32xbf16>
      %21 = vector.shape_cast %20 : vector<1x8x32xbf16> to vector<8x32xbf16>
      %22 = arith.extf %21 : vector<8x32xbf16> to vector<8x32xf32>
      %c0_19 = arith.constant 0 : index
      %c0_20 = arith.constant 0 : index
      %23 = vector.load %arg4[%c0_19, %c0_20] : memref<1x32xf32, #tpu.memory_space<vmem>>, vector<1x32xf32>
      %c0_21 = arith.constant 0 : index
      %c0_22 = arith.constant 0 : index
      %24 = vector.load %arg5[%c0_21, %c0_22] : memref<1x32xf32, #tpu.memory_space<vmem>>, vector<1x32xf32>
      %cst_23 = arith.constant dense<0.000000e+00> : vector<8xf32>
      %25 = vector.multi_reduction <add>, %22, %cst_23 [1] : vector<8x32xf32> to vector<8xf32>
      %26 = vector.shape_cast %25 : vector<8xf32> to vector<8x1xf32>
      %cst_24 = arith.constant 3.200000e+01 : f32
      %27 = vector.broadcast %cst_24 : f32 to vector<8x1xf32>
      %28 = arith.divf %26, %27 : vector<8x1xf32>
      %29 = vector.broadcast %28 : vector<8x1xf32> to vector<8x32xf32>
      %30 = arith.subf %22, %29 : vector<8x32xf32>
      %31 = arith.mulf %30, %30 : vector<8x32xf32>
      %cst_25 = arith.constant dense<0.000000e+00> : vector<8xf32>
      %32 = vector.multi_reduction <add>, %31, %cst_25 [1] : vector<8x32xf32> to vector<8xf32>
      %33 = vector.shape_cast %32 : vector<8xf32> to vector<8x1xf32>
      %cst_26 = arith.constant 3.200000e+01 : f32
      %34 = vector.broadcast %cst_26 : f32 to vector<8x1xf32>
      %35 = arith.divf %33, %34 : vector<8x1xf32>
      %36 = vector.broadcast %28 : vector<8x1xf32> to vector<8x32xf32>
      %37 = arith.subf %22, %36 : vector<8x32xf32>
      %cst_27 = arith.constant 9.99999974E-6 : f32
      %38 = vector.broadcast %cst_27 : f32 to vector<8x1xf32>
      %39 = arith.addf %35, %38 : vector<8x1xf32>
      %40 = math.rsqrt %39 : vector<8x1xf32>
      %41 = vector.broadcast %40 : vector<8x1xf32> to vector<8x32xf32>
      %42 = arith.mulf %37, %41 : vector<8x32xf32>
      %43 = vector.broadcast %23 : vector<1x32xf32> to vector<8x32xf32>
      %44 = arith.mulf %42, %43 : vector<8x32xf32>
      %45 = vector.broadcast %24 : vector<1x32xf32> to vector<8x32xf32>
      %46 = arith.addf %44, %45 : vector<8x32xf32>
      %47 = arith.truncf %46 : vector<8x32xf32> to vector<8x32xbf16>
      %c0_28 = arith.constant 0 : index
      %c0_29 = arith.constant 0 : index
      %48 = vector.load %arg11[%c0_28, %c0_29] : memref<8x32xbf16, #tpu.memory_space<vmem>>, vector<8x32xbf16>
      tpu.vector_store %arg11[%c0_28, %c0_29], %47 {strides = array<i32>} : memref<8x32xbf16, #tpu.memory_space<vmem>>, vector<8x32xbf16>,
      %cst_30 = arith.constant 0.000000e+00 : f32
      %49 = vector.broadcast %cst_30 : f32 to vector<8x32xf32>
      %c0_31 = arith.constant 0 : index
      %c0_32 = arith.constant 0 : index
      %50 = vector.load %arg12[%c0_31, %c0_32] : memref<8x32xf32, #tpu.memory_space<vmem>>, vector<8x32xf32>
      tpu.vector_store %arg12[%c0_31, %c0_32], %49 {strides = array<i32>} : memref<8x32xf32, #tpu.memory_space<vmem>>, vector<8x32xf32>,
    } else {
    }
    %c0 = arith.constant 0 : index
    %c0_1 = arith.constant 0 : index
    %3 = vector.load %arg11[%c0, %c0_1] : memref<8x32xbf16, #tpu.memory_space<vmem>>, vector<8x32xbf16>
    %c0_2 = arith.constant 0 : index
    %c0_3 = arith.constant 0 : index
    %4 = vector.load %arg6[%c0_2, %c0_3] : memref<32x128xbf16, #tpu.memory_space<vmem>>, vector<32x128xbf16>
    %cst = arith.constant dense<0.000000e+00> : vector<8x128xf32>
    %5 = tpu.matmul %3, %4, %cst {dimension_numbers = #tpu.dot_dimension_numbers<[1], [0], [0], [1], [0, 0, 1, 1], [], []>} : vector<8x32xbf16>, vector<32x128xbf16>, vector<8x128xf32> -> vector<8x128xf32>
    %c0_4 = arith.constant 0 : index
    %c0_5 = arith.constant 0 : index
    %6 = vector.load %arg7[%c0_4, %c0_5] : memref<1x128xf32, #tpu.memory_space<vmem>>, vector<1x128xf32>
    %7 = vector.broadcast %6 : vector<1x128xf32> to vector<8x128xf32>
    %8 = arith.addf %5, %7 : vector<8x128xf32>
    %cst_6 = arith.constant 0.000000e+00 : f32
    %9 = vector.broadcast %cst_6 : f32 to vector<8x128xf32>
    %10 = arith.maximumf %8, %9 : vector<8x128xf32>
    %c0_7 = arith.constant 0 : index
    %c0_8 = arith.constant 0 : index
    %11 = vector.load %arg12[%c0_7, %c0_8] : memref<8x32xf32, #tpu.memory_space<vmem>>, vector<8x32xf32>
    %12 = arith.truncf %10 : vector<8x128xf32> to vector<8x128xbf16>
    %c0_9 = arith.constant 0 : index
    %c0_10 = arith.constant 0 : index
    %13 = vector.load %arg8[%c0_9, %c0_10] : memref<128x32xbf16, #tpu.memory_space<vmem>>, vector<128x32xbf16>
    %cst_11 = arith.constant dense<0.000000e+00> : vector<8x32xf32>
    %14 = tpu.matmul %12, %13, %cst_11 {dimension_numbers = #tpu.dot_dimension_numbers<[1], [0], [0], [1], [0, 0, 1, 1], [], []>} : vector<8x128xbf16>, vector<128x32xbf16>, vector<8x32xf32> -> vector<8x32xf32>
    %15 = arith.addf %11, %14 : vector<8x32xf32>
    %c0_12 = arith.constant 0 : index
    %c0_13 = arith.constant 0 : index
    %16 = vector.load %arg12[%c0_12, %c0_13] : memref<8x32xf32, #tpu.memory_space<vmem>>, vector<8x32xf32>
    tpu.vector_store %arg12[%c0_12, %c0_13], %15 {strides = array<i32>} : memref<8x32xf32, #tpu.memory_space<vmem>>, vector<8x32xf32>,
    %c0_i32_14 = arith.constant 0 : i32
    %17 = arith.cmpi eq, %arg2, %c0_i32_14 : i32
    %18 = arith.extui %17 : i1 to i32
    %c0_i32_15 = arith.constant 0 : i32
    %19 = arith.cmpi ne, %18, %c0_i32_15 : i32
    scf.if %19 {
      %c0_16 = arith.constant 0 : index
      %c0_17 = arith.constant 0 : index
      %c0_18 = arith.constant 0 : index
      %20 = vector.load %arg3[%c0_16, %c0_17, %c0_18] : memref<1x8x32xbf16, #tpu.memory_space<vmem>>, vector<1x8x32xbf16>
      %21 = vector.shape_cast %20 : vector<1x8x32xbf16> to vector<8x32xbf16>
      %22 = arith.extf %21 : vector<8x32xbf16> to vector<8x32xf32>
      %c0_19 = arith.constant 0 : index
      %c0_20 = arith.constant 0 : index
      %23 = vector.load %arg12[%c0_19, %c0_20] : memref<8x32xf32, #tpu.memory_space<vmem>>, vector<8x32xf32>
      %24 = arith.addf %22, %23 : vector<8x32xf32>
      %c0_21 = arith.constant 0 : index
      %c0_22 = arith.constant 0 : index
      %25 = vector.load %arg9[%c0_21, %c0_22] : memref<1x32xf32, #tpu.memory_space<vmem>>, vector<1x32xf32>
      %26 = vector.broadcast %25 : vector<1x32xf32> to vector<8x32xf32>
      %27 = arith.addf %24, %26 : vector<8x32xf32>
      %28 = arith.truncf %27 : vector<8x32xf32> to vector<8x32xbf16>
      %c0_23 = arith.constant 0 : index
      %c0_24 = arith.constant 0 : index
      %c0_25 = arith.constant 0 : index
      %29 = vector.load %arg10[%c0_23, %c0_24, %c0_25] : memref<1x8x32xbf16, #tpu.memory_space<vmem>>, vector<1x8x32xbf16>
      %30 = vector.shape_cast %29 : vector<1x8x32xbf16> to vector<8x32xbf16>
      %31 = vector.shape_cast %28 : vector<8x32xbf16> to vector<1x8x32xbf16>
      tpu.vector_store %arg10[%c0_23, %c0_24, %c0_25], %31 {strides = array<i32>} : memref<1x8x32xbf16, #tpu.memory_space<vmem>>, vector<1x8x32xbf16>,
    } else {
    }
    return
  }
  func.func @transform_0(%arg0: i32, %arg1: i32, %arg2: i32) -> (i32, i32, i32) {
    %c0_i32 = arith.constant 0 : i32
    %c0_i32_0 = arith.constant 0 : i32
    return %arg0, %arg1, %c0_i32 : i32, i32, i32
  }
  func.func @transform_1(%arg0: i32, %arg1: i32, %arg2: i32) -> (i32, i32) {
    %c0_i32 = arith.constant 0 : i32
    %c0_i32_0 = arith.constant 0 : i32
    %c0_i32_1 = arith.constant 0 : i32
    return %c0_i32, %c0_i32_0 : i32, i32
  }
  func.func @transform_2(%arg0: i32, %arg1: i32, %arg2: i32) -> (i32, i32) {
    %c0_i32 = arith.constant 0 : i32
    %c0_i32_0 = arith.constant 0 : i32
    %c0_i32_1 = arith.constant 0 : i32
    return %c0_i32, %c0_i32_0 : i32, i32
  }
  func.func @transform_3(%arg0: i32, %arg1: i32, %arg2: i32) -> (i32, i32) {
    %c0_i32 = arith.constant 0 : i32
    %c0_i32_0 = arith.constant 0 : i32
    return %c0_i32, %arg2 : i32, i32
  }
  func.func @transform_4(%arg0: i32, %arg1: i32, %arg2: i32) -> (i32, i32) {
    %c0_i32 = arith.constant 0 : i32
    %c0_i32_0 = arith.constant 0 : i32
    return %c0_i32, %arg2 : i32, i32
  }
  func.func @transform_5(%arg0: i32, %arg1: i32, %arg2: i32) -> (i32, i32) {
    %c0_i32 = arith.constant 0 : i32
    %c0_i32_0 = arith.constant 0 : i32
    return %arg2, %c0_i32 : i32, i32
  }
  func.func @transform_6(%arg0: i32, %arg1: i32, %arg2: i32) -> (i32, i32) {
    %c0_i32 = arith.constant 0 : i32
    %c0_i32_0 = arith.constant 0 : i32
    %c0_i32_1 = arith.constant 0 : i32
    return %c0_i32, %c0_i32_0 : i32, i32
  }
  func.func @transform_7(%arg0: i32, %arg1: i32, %arg2: i32) -> (i32, i32, i32) {
    %c0_i32 = arith.constant 0 : i32
    %c0_i32_0 = arith.constant 0 : i32
    return %arg0, %arg1, %c0_i32 : i32, i32, i32
  }
}

module attributes {stable_mosaic.version = 11 : i64} {
  func.func @head_kernel(%arg0: i32, %arg1: i32, %arg2: memref<1x8x32xbf16, #tpu.memory_space<vmem>>, %arg3: memref<1x32xf32, #tpu.memory_space<vmem>>, %arg4: memref<1x32xf32, #tpu.memory_space<vmem>>, %arg5: memref<32x128xbf16, #tpu.memory_space<vmem>>, %arg6: memref<1x8x128xf32, #tpu.memory_space<vmem>>, %arg7: memref<8x32xbf16, #tpu.memory_space<vmem>>) attributes {dimension_semantics = [#tpu.dimension_semantics<parallel>, #tpu.dimension_semantics<arbitrary>], iteration_bounds = array<i64: 2, 1>, scalar_prefetch = 0 : i64, scratch_operands = 1 : i64, tpu.core_type = #tpu.core_type<tc>, window_params = [{transform_indices = @transform_0, window_bounds = array<i64: 1, 8, 32>}, {pipeline_mode = #tpu.pipeline_mode<synchronous>, transform_indices = @transform_1, window_bounds = array<i64: 1, 32>}, {pipeline_mode = #tpu.pipeline_mode<synchronous>, transform_indices = @transform_2, window_bounds = array<i64: 1, 32>}, {transform_indices = @transform_3, window_bounds = array<i64: 32, 128>}, {transform_indices = @transform_4, window_bounds = array<i64: 1, 8, 128>}]} {
    %c0_i32 = arith.constant 0 : i32
    %0 = arith.cmpi eq, %arg1, %c0_i32 : i32
    %1 = arith.extui %0 : i1 to i32
    %c0_i32_0 = arith.constant 0 : i32
    %2 = arith.cmpi ne, %1, %c0_i32_0 : i32
    scf.if %2 {
      %c0_7 = arith.constant 0 : index
      %c0_8 = arith.constant 0 : index
      %c0_9 = arith.constant 0 : index
      %9 = vector.load %arg2[%c0_7, %c0_8, %c0_9] : memref<1x8x32xbf16, #tpu.memory_space<vmem>>, vector<1x8x32xbf16>
      %10 = vector.shape_cast %9 : vector<1x8x32xbf16> to vector<8x32xbf16>
      %11 = arith.extf %10 : vector<8x32xbf16> to vector<8x32xf32>
      %c0_10 = arith.constant 0 : index
      %c0_11 = arith.constant 0 : index
      %12 = vector.load %arg3[%c0_10, %c0_11] : memref<1x32xf32, #tpu.memory_space<vmem>>, vector<1x32xf32>
      %c0_12 = arith.constant 0 : index
      %c0_13 = arith.constant 0 : index
      %13 = vector.load %arg4[%c0_12, %c0_13] : memref<1x32xf32, #tpu.memory_space<vmem>>, vector<1x32xf32>
      %cst_14 = arith.constant dense<0.000000e+00> : vector<8xf32>
      %14 = vector.multi_reduction <add>, %11, %cst_14 [1] : vector<8x32xf32> to vector<8xf32>
      %15 = vector.shape_cast %14 : vector<8xf32> to vector<8x1xf32>
      %cst_15 = arith.constant 3.200000e+01 : f32
      %16 = vector.broadcast %cst_15 : f32 to vector<8x1xf32>
      %17 = arith.divf %15, %16 : vector<8x1xf32>
      %18 = vector.broadcast %17 : vector<8x1xf32> to vector<8x32xf32>
      %19 = arith.subf %11, %18 : vector<8x32xf32>
      %20 = arith.mulf %19, %19 : vector<8x32xf32>
      %cst_16 = arith.constant dense<0.000000e+00> : vector<8xf32>
      %21 = vector.multi_reduction <add>, %20, %cst_16 [1] : vector<8x32xf32> to vector<8xf32>
      %22 = vector.shape_cast %21 : vector<8xf32> to vector<8x1xf32>
      %cst_17 = arith.constant 3.200000e+01 : f32
      %23 = vector.broadcast %cst_17 : f32 to vector<8x1xf32>
      %24 = arith.divf %22, %23 : vector<8x1xf32>
      %25 = vector.broadcast %17 : vector<8x1xf32> to vector<8x32xf32>
      %26 = arith.subf %11, %25 : vector<8x32xf32>
      %cst_18 = arith.constant 9.99999974E-6 : f32
      %27 = vector.broadcast %cst_18 : f32 to vector<8x1xf32>
      %28 = arith.addf %24, %27 : vector<8x1xf32>
      %29 = math.rsqrt %28 : vector<8x1xf32>
      %30 = vector.broadcast %29 : vector<8x1xf32> to vector<8x32xf32>
      %31 = arith.mulf %26, %30 : vector<8x32xf32>
      %32 = vector.broadcast %12 : vector<1x32xf32> to vector<8x32xf32>
      %33 = arith.mulf %31, %32 : vector<8x32xf32>
      %34 = vector.broadcast %13 : vector<1x32xf32> to vector<8x32xf32>
      %35 = arith.addf %33, %34 : vector<8x32xf32>
      %36 = arith.truncf %35 : vector<8x32xf32> to vector<8x32xbf16>
      %c0_19 = arith.constant 0 : index
      %c0_20 = arith.constant 0 : index
      %37 = vector.load %arg7[%c0_19, %c0_20] : memref<8x32xbf16, #tpu.memory_space<vmem>>, vector<8x32xbf16>
      tpu.vector_store %arg7[%c0_19, %c0_20], %36 {strides = array<i32>} : memref<8x32xbf16, #tpu.memory_space<vmem>>, vector<8x32xbf16>,
    } else {
    }
    %c0 = arith.constant 0 : index
    %c0_1 = arith.constant 0 : index
    %3 = vector.load %arg7[%c0, %c0_1] : memref<8x32xbf16, #tpu.memory_space<vmem>>, vector<8x32xbf16>
    %c0_2 = arith.constant 0 : index
    %c0_3 = arith.constant 0 : index
    %4 = vector.load %arg5[%c0_2, %c0_3] : memref<32x128xbf16, #tpu.memory_space<vmem>>, vector<32x128xbf16>
    %cst = arith.constant dense<0.000000e+00> : vector<8x128xf32>
    %5 = tpu.matmul %3, %4, %cst {dimension_numbers = #tpu.dot_dimension_numbers<[1], [0], [0], [1], [0, 0, 1, 1], [], []>} : vector<8x32xbf16>, vector<32x128xbf16>, vector<8x128xf32> -> vector<8x128xf32>
    %c0_4 = arith.constant 0 : index
    %c0_5 = arith.constant 0 : index
    %c0_6 = arith.constant 0 : index
    %6 = vector.load %arg6[%c0_4, %c0_5, %c0_6] : memref<1x8x128xf32, #tpu.memory_space<vmem>>, vector<1x8x128xf32>
    %7 = vector.shape_cast %6 : vector<1x8x128xf32> to vector<8x128xf32>
    %8 = vector.shape_cast %5 : vector<8x128xf32> to vector<1x8x128xf32>
    tpu.vector_store %arg6[%c0_4, %c0_5, %c0_6], %8 {strides = array<i32>} : memref<1x8x128xf32, #tpu.memory_space<vmem>>, vector<1x8x128xf32>,
    return
  }
  func.func @transform_0(%arg0: i32, %arg1: i32) -> (i32, i32, i32) {
    %c0_i32 = arith.constant 0 : i32
    %c0_i32_0 = arith.constant 0 : i32
    %c0_i32_1 = arith.constant 0 : i32
    return %arg0, %c0_i32, %c0_i32_0 : i32, i32, i32
  }
  func.func @transform_1(%arg0: i32, %arg1: i32) -> (i32, i32) {
    %c0_i32 = arith.constant 0 : i32
    %c0_i32_0 = arith.constant 0 : i32
    %c0_i32_1 = arith.constant 0 : i32
    return %c0_i32, %c0_i32_0 : i32, i32
  }
  func.func @transform_2(%arg0: i32, %arg1: i32) -> (i32, i32) {
    %c0_i32 = arith.constant 0 : i32
    %c0_i32_0 = arith.constant 0 : i32
    %c0_i32_1 = arith.constant 0 : i32
    return %c0_i32, %c0_i32_0 : i32, i32
  }
  func.func @transform_3(%arg0: i32, %arg1: i32) -> (i32, i32) {
    %c0_i32 = arith.constant 0 : i32
    %c0_i32_0 = arith.constant 0 : i32
    return %c0_i32, %arg1 : i32, i32
  }
  func.func @transform_4(%arg0: i32, %arg1: i32) -> (i32, i32, i32) {
    %c0_i32 = arith.constant 0 : i32
    %c0_i32_0 = arith.constant 0 : i32
    return %arg0, %c0_i32, %arg1 : i32, i32, i32
  }
}

</mosaic_0001>

<bundles_post_ra>
// kernel: opt_forward.11
= control target key start
LH: loop header
LB: loop body
LE: loop exit
PB: predicated region body
PF: predicated region fallthrough
CT: control target
= control target key end

     0   :  { %9 = vsyncpa [#allocation4], 0  ;;  %s749_s0 = inlined_call_operand.vmem [shape: bf16[2,8,32], index: 0, kind: input, shape index: {}]   ;;  %s750_s1 = inlined_call_operand.vmem [shape: f32[1,32], index: 1, kind: input, shape index: {}]   ;;  %s751_s2 = inlined_call_operand.vmem [shape: f32[1,32], index: 2, kind: input, shape index: {}]   ;;  %s752_s3 = inlined_call_operand.vmem [shape: bf16[32,128], index: 3, kind: input, shape index: {}]   ;;  %s753_s4 = inlined_call_operand.hbm [shape: f32[2,8,128], index: 4, kind: output, shape index: {}]  }
   0x1   :  { %11 = vsyncpa [#allocation4 + $0x1], 0  ;;  %s622_s15 = smov 0   ;;  %s624_s16 = smov 0  }
   0x2   :  { %s626_s17 = smov 0   ;;  %s628_s18 = smov 0  }
   0x3   :  { %s630_s19 = smov 0   ;;  %s632_s20 = smov 0  }
   0x4 LB: > { %s425_s21 = sadd.s32 4294967295, %s592_s20   ;;  %s426_s22 = sadd.s32 4294967294, %s592_s20   ;;  %s592_s20 = sphi %s632_s20, %s17_s20   ;;  %s588_s19 = sphi %s630_s19, %s760_s19   ;;  %s584_s18 = sphi %s628_s18, %s759_s18   ;;  %s580_s17 = sphi %s626_s17, %s758_s17   ;;  %s576_s16 = sphi %s624_s16, %s757_s16   ;;  %s572_s15 = sphi %s622_s15, %s756_s15  }
   0x5   : > { %s29_s23 = sadd.s32 1, %s588_s19  ;;  %s132_s24 = sadd.s32 1, %s580_s17 }
   0x6   : > { %p31_p0 = scmp.ge.s32.totalorder %s29_s23, 2  ;;  %p142_p1 = scmp.ne.s32.totalorder %s580_s17, %s576_s16 }
   0x7   : > { %p143_p2 = scmp.eq.s32.totalorder %s425_s21, 1  ;;  %p148_p3 = scmp.ne.s32.totalorder %s576_s16, %s572_s15 }
   0x8   : > { %s762_s23 = smov (%p31_p0, %s29_s23), 0  ;;  %p149_p5 = scmp.eq.s32.totalorder %s426_s22, 1 }
   0x9   : > { %p662_p4 = por %p143_p2, %p142_p1  ;;  %s127_s26 = ssub.s32 %s588_s19, %s762_s23 }
   0xa   : > { %p430_p6 = scmp.ge.s32.totalorder %s592_s20, 1  ;;  %p130_p7 = scmp.eq.s32.totalorder %s127_s26, 0 }
   0xb   : > { %p669_p8 = por %p149_p5, %p148_p3  ;;  %p187_p9 = scmp.lt.s32.totalorder %s592_s20, 3 }
   0xc   : > { %s675_s28 = scalar_select %p130_p7, %s580_s17, %s132_s24  }
   0xd   : > { %p188_p10 = pnand %p430_p6, %p187_p9 }
   0xe   : > { %p216_p11 = scmp.lt.s32.totalorder (!%p188_p10), %s584_s18, 1  ;;  %vm233_vm0 = vcmask (!%p188_p10), 261120   ;;  %v510_v8 = vld [vmem:[%s752_s3] sm:$0xff] (!%p188_p10)   ;;  %v594_v9 = vmov (!%p188_p10), 0.0   ;;  %v511_v10 = vld [vmem:[%s752_s3 + $0x8] sm:$0xff] (!%p188_p10)   ;;  %vm595_vm1 = vmmov (!%p188_p10), 0  }
   0xf   : > { %191 = sbr.rel (%p188_p10) target bundleno = 579 (0x243), region = 36  ;;  %445 = vmatprep.subr.bf16.mxu0 (!%p188_p10), %v594_v9  ;;  %449 = vmatprep.mubr.msk.bf16.mxu0 (!%p188_p10), %vm595_vm1, %v594_v9  ;;  %v433_v15 = vld [vmem:[%s750_s1] ss:$0 sm:$0xff] (!%p188_p10)  ;;  %vm263_vm2 = vcmask (!%p188_p10), 257024   ;;  %s213_s22 = sand.u32 (!%p188_p10), 1, %s576_s16  }
  0x10   : > { %446 = vmatpush3.bf16.msra.mxu0 (!%p188_p10), %v510_v8  ;;  %v434_v17 = vld [vmem:[%s751_s2] ss:$0 sm:$0xff] (!%p188_p10)  ;;  %s431_s24 = sshll.u32 (!%p188_p10), %s213_s22, 3  ;;  %s328_s8 = scalar_lea.sflag (!%p188_p10), [#allocation4], %s213_s22 }
  0x11   : > { %447 = vmatprep.subr.bf16.mxu0 (!%p188_p10), %v594_v9  ;;  %s215_s26 = scalar_lea.vmem (!%p188_p10), [#allocation3], %s431_s24 }
  0x14   : > { %448 = vmatpush3.bf16.msra.mxu0 (!%p188_p10), %v511_v10 }
  0x16   : > { %s217_s29 = scalar_select %p216_p11, %s584_s18, 1 }
  0x18   : > { %s432_s30 = sshll.u32 %s217_s29, 2  ;;  %s342_s29 = sshll.u32 %s215_s26, 4  ;;  %s699_s29 = int_to_ptr.vmem [resolvable:$true] %s342_s29 }
  0x19   : > { %s219_s7 = scalar_lea.vmem %s749_s0, %s432_s30  ;;  %s439_s30 = sshll.u32 %s584_s18, 7 }
  0x1a   : > { %v229_v0 = vld [vmem:[%s219_s7] sm:$0xf]  ;;  %s704_s7 = scalar_lea.hbm %s753_s4, %s439_s30  ;;  %s514_s9 = scalar_lea.vmem %s699_s29, 128 }
  0x1b   : > { %v230_v1 = vunpack.c.l.bf16 %v229_v0  ;;  %p515_p12 = scmp.ne.s32.totalorder %s699_s29, %s514_s9  ;;  %s596_s18 = smov [#allocation3]  }
  0x1c   : > { %s518_s10 = sshll.u32 %s596_s18, 4  ;;  %s519_s10 = int_to_ptr.vmem [resolvable:$false] %s518_s10 }
  0x1d   : > { %v234_v2 = vsel %vm233_vm0, %v230_v1, 0.0  ;;  %p516_p13 = pnand %p515_p12, %p662_p4  ;;  %s520_s11 = scalar_lea.vmem %s519_s10, 256 }
  0x1e   : > { %235 = vadd.xlane.f32.xlu0 %v234_v2  ;;  %p521_p1 = scmp.lt.s32.totalorder %s699_s29, %s519_s10  ;;  %p522_p2 = scmp.lt.s32.totalorder %s520_s11, %s514_s9 }
  0x1f   : > { %p517_p0 = pneg %p516_p13 }
  0x20   : > { %p523_p3 = por %p522_p2, %p521_p1 }
  0x22   : > { %p524_p5 = pnand %p523_p3, %p517_p0 }
  0xab   : > { %v236_v3 = vpop.xlane.xlu0 %235 }
  0xac   : > { %v238_v4 = vmul.f32 0.03125, %v236_v3 }
  0xae   : > { %v239_v5 = vsub.f32 %v230_v1, %v238_v4 }
  0xb0   : > { %v240_v6 = vmul.f32 %v239_v5, %v239_v5 }
  0xb2   : > { %v241_v7 = vsel %vm233_vm0, %v240_v6, 0.0 }
  0xb3   : > { %242 = vadd.xlane.f32.xlu0 %v241_v7 }
 0x140   : > { %v243_v11 = vpop.xlane.xlu0 %242 }
 0x141   : > { %v244_v12 = vmul.f32 0.03125, %v243_v11 }
 0x143   : > { %v245_v13 = vadd.f32 1e-05, %v244_v12 }
 0x145   : > { %512 = vrsqrt.f32 %v245_v13 }
 0x14f   : > { %v513_v14 = vpop.eup %512 }
 0x150   : > { %v247_v16 = vmul.f32 %v513_v14, %v239_v5 }
 0x152   : > { %v254_v18 = vmul.f32 %v433_v15, %v247_v16 }
 0x154   : > { %v261_v19 = vadd.f32 %v434_v17, %v254_v18 }
 0x156   : > { %v262_v20 = vpack.c.bf16 %v261_v19, %v261_v19 }
 0x158   : > { %264 = vst.msk [vmem:[#allocation2] sm:$0xf] %vm263_vm2, %v262_v20 }
 0x15f   : > { %v265_v21 = vld [vmem:[#allocation2] sm:$0xf] }
 0x160   : > { %450 = vmatmul.mubr.msk.bf16.vlgmr.msra.gmra.mrb[0].mxu0 %vm233_vm0, %v265_v21 }
 0x233   : > { %v320_v22 = vpop.f32.mrb[0].mxu0 }
 0x234   : > { %326 = vst [vmem:[%s215_s26] sm:$0xff] %v320_v22  ;;  %v451_v23 = vpop.f32.mrb[1].mxu0 }
 0x235   : > { %v323_v24 = vpop.f32.mrb[2].mxu0 }
 0x236   : > { %527 = shalt.err (!%p524_p5)
}
 0x237   : > { %s528_s12 = scalar_lea.hbm %s704_s7, 128  ;;  %s532_s21 = scalar_lea.hbm %s753_s4, 256 }
 0x238   : > { %p529_p6 = scmp.ne.s32.totalorder %s704_s7, %s528_s12  ;;  %p533_p10 = scmp.lt.u32.totalorder %s704_s7, %s753_s4 }
 0x239   : > { %p534_p11 = scmp.lt.u32.totalorder %s532_s21, %s528_s12  ;;  %p536_p13 = scmp.lt.u32.totalorder %s528_s12, %s704_s7 }
 0x23a   : > { %p530_p7 = pnand %p529_p6, %p662_p4 }
 0x23b   : > { %p535_p12 = por %p534_p11, %p533_p10 }
 0x23c   : > { %p531_p9 = pneg %p530_p7 }
 0x23d   : > { %p537_p0 = por %p536_p13, %p535_p12 }
 0x23f   : > { %p538_p1 = pnand %p537_p0, %p531_p9 }
 0x241   : > { %541 = shalt.err (!%p538_p1)
}
 0x242   : > { %453 = dma.vmem_to_hbm [thread:$0]  (%p662_p4), %s699_s29, 128, %s704_s7, %s328_s8   ;;  %v452_v25 = vpop.f32.mrb[3].mxu0 }
 0x243 PF: > { %p459_p2 = scmp.ge.s32.totalorder %s592_s20, 2  ;;  %s354_s26 = sand.u32 1, %s572_s15  }
 0x244   : > { %s355_s30 = scalar_lea.sflag [#allocation4], %s354_s26 }
 0x245   : > { %p456_p3 = pnand %p459_p2, %p669_p8 }
 0x247   : > { %567 = dma.done.wait (!%p456_p3), %s355_s30, 128  }
 0x248   : > { %569 = vsyncadd (!%p456_p3), %s355_s30, 4294967168  ;;  %s17_s20 = sadd.s32 1, %s592_s20   ;;  %s756_s15 = smov %s576_s16 }
 0x249   : > { %p14_p5 = scmp.ge.s32.totalorder %s17_s20, 4   ;;  %s757_s16 = smov %s580_s17 }
 0x24a   : > { %s758_s17 = smov %s675_s28  ;;  %s759_s18 = smov %s588_s19 }
 0x24b   : > { %s760_s19 = smov %s762_s23  ;;  %16 = sbr.rel (!%p14_p5) target bundleno = 4 (0x4), region = 78 }
 0x252   :  { %360 = vsyncpa [#allocation4], 1 }
 0x253   :  { %362 = vsyncpa [#allocation4 + $0x1], 1 }

// kernel: opt_forward.8
= control target key start
LH: loop header
LB: loop body
LE: loop exit
PB: predicated region body
PF: predicated region fallthrough
CT: control target
= control target key end

     0   :  { %s893_s24 = smov 0   ;;  %s895_s25 = smov 0   ;;  %s986_s0 = inlined_call_operand.vmem [shape: bf16[2,8,32], index: 0, kind: input, shape index: {}]   ;;  %s987_s1 = inlined_call_operand.vmem [shape: f32[1,32], index: 1, kind: input, shape index: {}]   ;;  %s988_s2 = inlined_call_operand.vmem [shape: f32[1,32], index: 2, kind: input, shape index: {}]   ;;  %s989_s3 = inlined_call_operand.vmem [shape: bf16[32,128], index: 3, kind: input, shape index: {}]   ;;  %s990_s4 = inlined_call_operand.vmem [shape: f32[1,128], index: 4, kind: input, shape index: {}]   ;;  %s991_s5 = inlined_call_operand.vmem [shape: bf16[128,32], index: 5, kind: input, shape index: {}]   ;;  %s992_s6 = inlined_call_operand.vmem [shape: f32[1,32], index: 6, kind: input, shape index: {}]   ;;  %s993_s7 = inlined_call_operand.vmem [shape: bf16[2,8,32], index: 7, kind: output, shape index: {}]  }
   0x1   :  { %s897_s26 = smov 0  }
   0x2 LB: > { %s36_s27 = sadd.s32 1, %s845_s25  ;;  %p729_p0 = scmp.ge.s32.totalorder %s849_s26, 1  ;;  %s849_s26 = sphi %s897_s26, %s17_s26   ;;  %s845_s25 = sphi %s895_s25, %s995_s25   ;;  %s841_s24 = sphi %s893_s24, %s994_s24  }
   0x3   : > { %p38_p1 = scmp.ge.s32.totalorder %s36_s27, 2  ;;  %p290_p2 = scmp.lt.s32.totalorder %s849_s26, 3 }
   0x5   : > { %s997_s27 = smov (%p38_p1, %s36_s27), 0  ;;  %p291_p3 = pnand %p729_p0, %p290_p2 }
   0x6   : > { %p338_p4 = scmp.lt.s32.totalorder (!%p291_p3), %s841_s24, 1  ;;  %vm374_vm0 = vcmask (!%p291_p3), 261120   ;;  %v815_v8 = vld [vmem:[%s989_s3] sm:$0xff] (!%p291_p3)   ;;  %v851_v9 = vmov (!%p291_p3), 0.0   ;;  %v816_v10 = vld [vmem:[%s989_s3 + $0x8] sm:$0xff] (!%p291_p3)   ;;  %vm852_vm1 = vmmov (!%p291_p3), 0  }
   0x7   : > { %294 = sbr.rel (%p291_p3) target bundleno = 790 (0x316), region = 48  ;;  %761 = vmatprep.subr.bf16.mxu0 (!%p291_p3), %v851_v9  ;;  %406 = vst.msk [vmem:[#allocation3] sm:$0xff] (!%p291_p3), %vm374_vm0, %v851_v9  ;;  %769 = vmatprep.subr.bf16.mxu1 (!%p291_p3), %v851_v9  ;;  %v817_v11 = vld [vmem:[%s991_s5] sm:$0xff] (!%p291_p3)   ;;  %v818_v12 = vld [vmem:[%s991_s5 + $0x8] sm:$0xff] (!%p291_p3)   ;;  %v819_v13 = vld [vmem:[%s991_s5 + $0x10] sm:$0xff] (!%p291_p3)   ;;  %vm404_vm2 = vcmask (!%p291_p3), 257024  }
   0x8   : > { %762 = vmatpush3.bf16.msra.mxu0 (!%p291_p3), %v815_v8  ;;  %765 = vmatprep.mubr.msk.bf16.mxu0 (!%p291_p3), %vm852_vm1, %v851_v9  ;;  %v820_v14 = vld [vmem:[%s991_s5 + $0x18] sm:$0xff] (!%p291_p3)   ;;  %v821_v15 = vld [vmem:[%s991_s5 + $0x20] sm:$0xff] (!%p291_p3)   ;;  %v822_v16 = vld [vmem:[%s991_s5 + $0x28] sm:$0xff] (!%p291_p3)  }
   0x9   : > { %763 = vmatprep.subr.bf16.mxu0 (!%p291_p3), %v851_v9  ;;  %785 = vmatprep.mubr.msk.bf16.mxu1 (!%p291_p3), %vm852_vm1, %v851_v9  ;;  %v732_v21 = vld [vmem:[%s987_s1] ss:$0 sm:$0xff] (!%p291_p3)  ;;  %v823_v28 = vld [vmem:[%s991_s5 + $0x30] sm:$0xff] (!%p291_p3)   ;;  %v824_v29 = vld [vmem:[%s991_s5 + $0x38] sm:$0xff] (!%p291_p3)  }
   0xa   : > { %770 = vmatpush3.bf16.msra.mxu1 (!%p291_p3), %v817_v11  ;;  %v733_v23 = vld [vmem:[%s988_s2] ss:$0 sm:$0xff] (!%p291_p3) }
   0xb   : > { %771 = vmatprep.subr.bf16.mxu1 (!%p291_p3), %v851_v9  ;;  %v734_v30 = vld [vmem:[%s990_s4] ss:$0 sm:$0xff] (!%p291_p3) }
   0xc   : > { %764 = vmatpush3.bf16.msra.mxu0 (!%p291_p3), %v816_v10  ;;  %v746_v47 = vld [vmem:[%s992_s6] ss:$0 sm:$0xff] (!%p291_p3) }
   0xe   : > { %s999_s24 = smov (!%p338_p4, %s841_s24), 1  ;;  %772 = vmatpush3.bf16.msra.mxu1 %v818_v12  ;;  %v476_v38 = vld [vmem:[#allocation3] sm:$0xff] }
   0xf   : > { %s730_s28 = sshll.u32 %s999_s24, 2  ;;  %773 = vmatprep.subr.bf16.mxu1 %v851_v9 }
  0x10   : > { %s919_s8 = scalar_lea.vmem %s986_s0, %s730_s28  ;;  %s364_s22 = scalar_lea.vmem %s993_s7, %s730_s28 }
  0x11   : > { %v370_v0 = vld [vmem:[%s919_s8] sm:$0xf] }
  0x12   : > { %v371_v1 = vunpack.c.l.bf16 %v370_v0  ;;  %774 = vmatpush3.bf16.msra.mxu1 %v819_v13  ;;  %v587_v44 = vld [vmem:[%s919_s8] sm:$0xf] }
  0x13   : > { %775 = vmatprep.subr.bf16.mxu1 %v851_v9  ;;  %v588_v45 = vunpack.c.l.bf16 %v587_v44 }
  0x14   : > { %v375_v2 = vsel %vm374_vm0, %v371_v1, 0.0 }
  0x15   : > { %376 = vadd.xlane.f32.xlu0 %v375_v2 }
  0x16   : > { %776 = vmatpush3.bf16.msra.mxu1 %v820_v14 }
  0x17   : > { %777 = vmatprep.subr.bf16.mxu1 %v851_v9 }
  0x1a   : > { %778 = vmatpush3.bf16.msra.mxu1 %v821_v15 }
  0x1b   : > { %779 = vmatprep.subr.bf16.mxu1 %v851_v9 }
  0x1e   : > { %780 = vmatpush3.bf16.msra.mxu1 %v822_v16 }
  0x1f   : > { %781 = vmatprep.subr.bf16.mxu1 %v851_v9 }
  0x22   : > { %782 = vmatpush3.bf16.msra.mxu1 %v823_v28 }
  0x23   : > { %783 = vmatprep.subr.bf16.mxu1 %v851_v9 }
  0x26   : > { %784 = vmatpush3.bf16.msra.mxu1 %v824_v29 }
  0xa2   : > { %v377_v3 = vpop.xlane.xlu0 %376 }
  0xa3   : > { %v379_v4 = vmul.f32 0.03125, %v377_v3 }
  0xa5   : > { %v380_v5 = vsub.f32 %v371_v1, %v379_v4 }
  0xa7   : > { %v381_v6 = vmul.f32 %v380_v5, %v380_v5 }
  0xa9   : > { %v382_v7 = vsel %vm374_vm0, %v381_v6, 0.0 }
  0xaa   : > { %383 = vadd.xlane.f32.xlu0 %v382_v7 }
 0x137   : > { %v384_v17 = vpop.xlane.xlu0 %383 }
 0x138   : > { %v385_v18 = vmul.f32 0.03125, %v384_v17 }
 0x13a   : > { %v386_v19 = vadd.f32 1e-05, %v385_v18 }
 0x13c   : > { %825 = vrsqrt.f32 %v386_v19 }
 0x146   : > { %v826_v20 = vpop.eup %825 }
 0x147   : > { %v388_v22 = vmul.f32 %v826_v20, %v380_v5 }
 0x149   : > { %v395_v24 = vmul.f32 %v732_v21, %v388_v22 }
 0x14b   : > { %v402_v25 = vadd.f32 %v733_v23, %v395_v24 }
 0x14d   : > { %v403_v26 = vpack.c.bf16 %v402_v25, %v402_v25 }
 0x14f   : > { %405 = vst.msk [vmem:[#allocation2] sm:$0xf] %vm404_vm2, %v403_v26 }
 0x156   : > { %v407_v27 = vld [vmem:[#allocation2] sm:$0xf] }
 0x157   : > { %766 = vmatmul.mubr.msk.bf16.vlgmr.msra.gmra.mrb[0].mxu0 %vm374_vm0, %v407_v27 }
 0x22a   : > { %v469_v31 = vpop.f32.mrb[0].mxu0 }
 0x22b   : > { %v470_v32 = vadd.f32 %v734_v30, %v469_v31  ;;  %v767_v33 = vpop.f32.mrb[1].mxu0 }
 0x22c   : > { %v472_v34 = vpop.f32.mrb[2].mxu0 }
 0x22d   : > { %v475_v35 = vmax.f32 %v470_v32, 0.0  ;;  %v768_v36 = vpop.f32.mrb[3].mxu0 }
 0x22f   : > { %v477_v37 = vpack.c.bf16 %v475_v35, %v475_v35 }
 0x231   : > { %786 = vmatmul.mubr.bf16.vlgmr.msra.gmra.mrb[0].mxu1 %v477_v37 }
 0x304   : > { %v576_v39 = vpop.f32.mrb[0].mxu1 }
 0x305   : > { %v582_v40 = vadd.f32 %v576_v39, %v476_v38  ;;  %v787_v41 = vpop.f32.mrb[1].mxu1 }
 0x306   : > { %v579_v42 = vpop.f32.mrb[2].mxu1 }
 0x307   : > { %583 = vst.msk [vmem:[#allocation3] sm:$0xff] %vm374_vm0, %v582_v40  ;;  %v788_v43 = vpop.f32.mrb[3].mxu1 }
 0x30e   : > { %v589_v46 = vld [vmem:[#allocation3] sm:$0xff] }
 0x30f   : > { %v590_v48 = vadd.f32 %v589_v46, %v588_v45 }
 0x311   : > { %v598_v49 = vadd.f32 %v746_v47, %v590_v48 }
 0x313   : > { %v599_v50 = vpack.c.bf16 %v598_v49, %v598_v49 }
 0x315   : > { %601 = vst.msk [vmem:[%s364_s22] sm:$0xf] %vm404_vm2, %v599_v50 }
 0x316 PF: > { %s17_s26 = sadd.s32 1, %s849_s26   ;;  %s994_s24 = smov %s845_s25 }
 0x317   : > { %p14_p5 = scmp.ge.s32.totalorder %s17_s26, 4   ;;  %s995_s25 = smov %s997_s27 }
 0x319   :  { %16 = sbr.rel (!%p14_p5) target bundleno = 2 (0x2), region = 95 }

// kernel: opt_forward.6
= control target key start
LH: loop header
LB: loop body
LE: loop exit
PB: predicated region body
PF: predicated region fallthrough
CT: control target
= control target key end

     0   :  { %s2534_s0 = inlined_call_operand.vmem [shape: s32[16], index: 0, kind: input, shape index: {}]   ;;  %s2535_s1 = inlined_call_operand.vmem [shape: bf16[128,1,32], index: 1, kind: input, shape index: {}, may-alias: {1,2,3,4,5,6,7,8}]   ;;  %s2536_s2 = inlined_call_operand.vmem [shape: bf16[128,1,32], index: 2, kind: input, shape index: {}, may-alias: {1,2,3,4,5,6,7,8}]   ;;  %s2537_s3 = inlined_call_operand.vmem [shape: bf16[128,1,32], index: 3, kind: input, shape index: {}, may-alias: {1,2,3,4,5,6,7,8}]   ;;  %s2538_s4 = inlined_call_operand.vmem [shape: bf16[128,1,32], index: 4, kind: input, shape index: {}, may-alias: {1,2,3,4,5,6,7,8}]   ;;  %s2539_s5 = inlined_call_operand.vmem [shape: bf16[128,1,32], index: 5, kind: input, shape index: {}, may-alias: {1,2,3,4,5,6,7,8}]   ;;  %s2540_s6 = inlined_call_operand.vmem [shape: bf16[128,1,32], index: 6, kind: input, shape index: {}, may-alias: {1,2,3,4,5,6,7,8}]   ;;  %s2541_s7 = inlined_call_operand.vmem [shape: bf16[128,1,32], index: 7, kind: input, shape index: {}, may-alias: {1,2,3,4,5,6,7,8}]   ;;  %s2542_s8 = inlined_call_operand.vmem [shape: bf16[128,1,32], index: 8, kind: input, shape index: {}, may-alias: {1,2,3,4,5,6,7,8}]   ;;  %s2543_s9 = inlined_call_operand.vmem [shape: bf16[18,1,32], index: 9, kind: input, shape index: {}, may-alias: {9,10,11,12,13,14,15,16}]   ;;  %s2544_s10 = inlined_call_operand.vmem [shape: bf16[18,1,32], index: 10, kind: input, shape index: {}, may-alias: {9,10,11,12,13,14,15,16}]   ;;  %s2545_s11 = inlined_call_operand.vmem [shape: bf16[18,1,32], index: 11, kind: input, shape index: {}, may-alias: {9,10,11,12,13,14,15,16}]   ;;  %s2546_s12 = inlined_call_operand.vmem [shape: bf16[18,1,32], index: 12, kind: input, shape index: {}, may-alias: {9,10,11,12,13,14,15,16}]   ;;  %s2547_s13 = inlined_call_operand.vmem [shape: bf16[18,1,32], index: 13, kind: input, shape index: {}, may-alias: {9,10,11,12,13,14,15,16}]   ;;  %s2548_s14 = inlined_call_operand.vmem [shape: bf16[18,1,32], index: 14, kind: input, shape index: {}, may-alias: {9,10,11,12,13,14,15,16}]   ;;  %s2549_s15 = inlined_call_operand.vmem [shape: bf16[18,1,32], index: 15, kind: input, shape index: {}, may-alias: {9,10,11,12,13,14,15,16}]   ;;  %s2550_s16 = inlined_call_operand.vmem [shape: bf16[18,1,32], index: 16, kind: input, shape index: {}, may-alias: {9,10,11,12,13,14,15,16}]   ;;  %s2551_s17 = inlined_call_operand.vmem [shape: bf16[2,8,32], index: 17, kind: output, shape index: {}]  }
   0x1   :  { %2563 = sst [smem:[#allocation13_spill]] %s2534_s0 }
   0x2   :  { %2564 = sst [smem:[#allocation14_spill]] %s2535_s1  ;;  %s2579_s26 = sld [smem:[#allocation13_spill]] }
   0x3   :  { %2565 = sst [smem:[#allocation15_spill]] %s2536_s2 }
   0x4   :  { %2566 = sst [smem:[#allocation16_spill]] %s2537_s3 }
   0x5   :  { %2567 = sst [smem:[#allocation17_spill]] %s2538_s4 }
   0x6   :  { %2568 = sst [smem:[#allocation18_spill]] %s2539_s5 }
   0x7   :  { %2569 = sst [smem:[#allocation19_spill]] %s2540_s6 }
   0x8   :  { %2570 = sst [smem:[#allocation20_spill]] %s2541_s7 }
   0x9   :  { %2571 = sst [smem:[#allocation21_spill]] %s2542_s8  ;;  %s22_s8 = sshll.u32 %s2579_s26, 4  ;;  %s23_s8 = int_to_ptr.vmem [resolvable:$true] %s22_s8 }
   0xa   :  { %2572 = sst [smem:[#allocation22_spill]] %s2544_s10  ;;  %s2178_s27 = scalar_lea.vmem %s23_s8, 16 }
   0xb   :  { %2573 = sst [smem:[#allocation23_spill]] %s2546_s12  ;;  %p2179_p0 = scmp.ne.s32.totalorder %s23_s8, %s2178_s27 }
   0xc   :  { %2574 = sst [smem:[#allocation24_spill]] %s2547_s13  ;;  %p2183_p1 = scmp.lt.s32.totalorder %s23_s8, %s23_s8 }
   0xd   :  { %2575 = sst [smem:[#allocation25_spill]] %s2548_s14  ;;  %p2184_p2 = scmp.lt.s32.totalorder %s2178_s27, %s2178_s27 }
   0xe   :  { %2576 = sst [smem:[#allocation26_spill]] %s2549_s15 }
   0xf   :  { %2577 = sst [smem:[#allocation27_spill]] %s2550_s16  ;;  %p2185_p3 = por %p2184_p2, %p2183_p1 }
  0x10   :  { %2578 = sst [smem:[#allocation28_spill]] %s2551_s17 }
  0x11   :  { %p2186_p4 = pnand %p2185_p3, %p2179_p0 }
  0x13   :  { %2189 = shalt.err (!%p2186_p4)  }
  0x14   :  { %s2200_s28 = smov [#allocation3]  }
  0x15   :  { %25 = dma.vmem_to_smem %s23_s8, 16, %s2200_s28, [#allocation2] }
  0x16   :  { %2194 = dma.done.wait [#allocation2], 16 }
  0x17   :  { %2195 = vsyncadd [#allocation2], 4294967280 }
  0x18   :  { %27 = sfence }
  0x19   :  { %s2294_s29 = smov 0  }
  0x1a LB: > { %2580 = sst [smem:[#allocation5_spill]] %s2198_s29  ;;  %s2300_s0 = sadd.s32 4294967295, %s2198_s29   ;;  %s2198_s29 = sphi %s2294_s29, %s33_s29  }
  0x1b   : > { %2581 = sst [smem:[#allocation6_spill]] %s2300_s0  ;;  %p2093_p5 = scmp.ge.s32.totalorder %s2198_s29, 1 }
  0x1c   : > { %p1155_p6 = scmp.lt.s32.totalorder %s2198_s29, 3 }
  0x1e   : > { %p1156_p7 = pnand %p2093_p5, %p1155_p6 }
  0x20   : > { %1159 = sbr.rel (%p1156_p7) target bundleno = 139 (0x8b), region = 84 }
  0x27   : > { %s2305_s8 = sshll.u32 %s2300_s0, 3  ;;  %s2594_s10 = sld [smem:[#allocation22_spill]]  ;;  %v1766_v0 = vlaneseq  ;;  %vm1807_vm0 = vcmask 1040384   ;;  %vm1809_vm1 = vcmask 1041408   ;;  %vm1811_vm2 = vcmask 1042432  }
  0x28   : > { %s1390_s30 = sld [smem:[#allocation3 + %s2305_s8]]  ;;  %s2309_s18 = sadd.s32 1, %s2305_s8  ;;  %vm1813_vm3 = vcmask 1043456   ;;  %vm1815_vm4 = vcmask 1044480   ;;  %vm1817_vm5 = vcmask 1045504   ;;  %vm1819_vm6 = vcmask 1046528  }
  0x29   : > { %s1398_s19 = sld [smem:[#allocation3 + %s2309_s18]]  ;;  %s2313_s1 = sadd.s32 2, %s2305_s8  ;;  %v1767_v3 = vshrl.u32 %v1766_v0, 7  ;;  %vm1822_vm7 = vcmask 257024  }
  0x2a   : > { %s1407_s20 = sld [smem:[#allocation3 + %s2313_s1]]  ;;  %s2317_s21 = sadd.s32 3, %s2305_s8 }
  0x2b   : > { %s1416_s22 = sld [smem:[#allocation3 + %s2317_s21]]  ;;  %s2321_s23 = sadd.s32 4, %s2305_s8  ;;  %v2482_v17 = vsub.s32 0, %v1767_v3 }
  0x2c   : > { %s1425_s24 = sld [smem:[#allocation3 + %s2321_s23]]  ;;  %s2325_s25 = sadd.s32 5, %s2305_s8 }
  0x2d   : > { %s1434_s26 = sld [smem:[#allocation3 + %s2325_s25]]  ;;  %s2329_s27 = sadd.s32 6, %s2305_s8 }
  0x2e   : > { %p1391_p8 = scmp.lt.s32.totalorder %s1390_s30, 127  ;;  %2582 = sst [smem:[#allocation7_spill]] %s2329_s27 }
  0x2f   : > { %p1399_p9 = scmp.lt.s32.totalorder %s1398_s19, 127  ;;  %s1443_s28 = sld [smem:[#allocation3 + %s2329_s27]] }
  0x30   : > { %s2631_s30 = smov (!%p1391_p8, %s1390_s30), 127  ;;  %p1408_p10 = scmp.lt.s32.totalorder %s1407_s20, 127 }
  0x31   : > { %2583 = sst [smem:[#allocation8_spill]] %s2631_s30  ;;  %s2633_s19 = smov (!%p1399_p9, %s1398_s19), 127 }
  0x32   : > { %2584 = sst [smem:[#allocation9_spill]] %s2633_s19  ;;  %p1417_p11 = scmp.lt.s32.totalorder %s1416_s22, 127 }
  0x33   : > { %s2337_s29 = sadd.s32 7, %s2305_s8  ;;  %s2635_s20 = smov (!%p1408_p10, %s1407_s20), 127 }
  0x34   : > { %s2637_s22 = smov (!%p1417_p11, %s1416_s22), 127  ;;  %p1426_p12 = scmp.lt.s32.totalorder %s1425_s24, 127 }
  0x35   : > { %p1435_p13 = scmp.lt.s32.totalorder %s1434_s26, 127  ;;  %p1444_p0 = scmp.lt.s32.totalorder %s1443_s28, 127 }
  0x36   : > { %s2639_s24 = smov (!%p1426_p12, %s1425_s24), 127  ;;  %s1452_s7 = sld [smem:[#allocation3 + %s2337_s29]] }
  0x37   : > { %s2641_s26 = smov (!%p1435_p13, %s1434_s26), 127  ;;  %s2643_s28 = smov (!%p1444_p0, %s1443_s28), 127 }
  0x38   : > { %2587 = sst [smem:[#allocation10_spill]] %s2641_s26  ;;  %s1461_s30 = ssub.s32 0, %s2305_s8 }
  0x39   : > { %2590 = sst [smem:[#allocation11_spill]] %s2643_s28  ;;  %p1460_p1 = scmp.lt.s32.totalorder %s2305_s8, 0 }
  0x3a   : > { %s2103_s19 = smin.u32 %s2305_s8, %s1461_s30  ;;  %s1493_s17 = ssub.s32 0, %s2309_s18 }
  0x3b   : > { %s1463_s3 = sand.u32 7, %s2103_s19   ;;  %s2107_s0 = smin.u32 %s1493_s17, %s2309_s18 }
  0x3c   : > { %s1464_s15 = ssub.s32 0, %s1463_s3  ;;  %p1453_p2 = scmp.lt.s32.totalorder %s1452_s7, 127 }
  0x3d   : > { %s2645_s15 = smov (!%p1460_p1, %s1464_s15), %s1463_s3  ;;  %p1492_p4 = scmp.lt.s32.totalorder %s2309_s18, 0 }
  0x3e   : > { %s2647_s7 = smov (!%p1453_p2, %s1452_s7), 127  ;;  %p2105_p3 = scmp.lt.s32.totalorder %s2645_s15, 0 }
  0x3f   : > { %2593 = sst [smem:[#allocation12_spill]] %s2647_s7  ;;  %s1470_s13 = sadd.s32 8, %s2645_s15 }
  0x40   : > { %s1495_s14 = sand.u32 7, %s2107_s0   ;;  %s2649_s13 = smov (!%p2105_p3, %s1470_s13), %s2645_s15 }
  0x41   : > { %s1496_s8 = ssub.s32 0, %s1495_s14  ;;  %p1525_p5 = scmp.lt.s32.totalorder %s2313_s1, 0 }
  0x42   : > { %s1472_s30 = sadd.s32 2, %s2649_s13  ;;  %s1526_s19 = ssub.s32 0, %s2313_s1 }
  0x43   : > { %p1473_p6 = scmp.lt.s32.totalorder %s1472_s30, 17  ;;  %s2111_s12 = smin.u32 %s1526_s19, %s2313_s1 }
  0x44   : > { %s2651_s8 = smov (!%p1492_p4, %s1496_s8), %s1495_s14  ;;  %s1528_s15 = sand.u32 7, %s2111_s12  }
  0x45   : > { %s2653_s30 = smov (!%p1473_p6, %s1472_s30), 17  ;;  %p2109_p7 = scmp.lt.s32.totalorder %s2651_s8, 0 }
  0x46   : > { %s1502_s3 = sadd.s32 8, %s2651_s8  ;;  %s1529_s17 = ssub.s32 0, %s1528_s15 }
  0x47   : > { %s2655_s3 = smov (!%p2109_p7, %s1502_s3), %s2651_s8  ;;  %p1558_p8 = scmp.lt.s32.totalorder %s2317_s21, 0 }
  0x48   : > { %s1504_s13 = sadd.s32 2, %s2655_s3  ;;  %s1559_s16 = ssub.s32 0, %s2317_s21 }
  0x49   : > { %p1505_p9 = scmp.lt.s32.totalorder %s1504_s13, 17  ;;  %s2115_s14 = smin.u32 %s1559_s16, %s2317_s21 }
  0x4a   : > { %s2657_s17 = smov (!%p1525_p5, %s1529_s17), %s1528_s15  ;;  %s1561_s18 = sand.u32 7, %s2115_s14  }
  0x4b   : > { %s2659_s13 = smov (!%p1505_p9, %s1504_s13), 17  ;;  %p2113_p10 = scmp.lt.s32.totalorder %s2657_s17, 0 }
  0x4c   : > { %s1535_s19 = sadd.s32 8, %s2657_s17  ;;  %s1562_s3 = ssub.s32 0, %s1561_s18 }
  0x4d   : > { %s2661_s19 = smov (!%p2113_p10, %s1535_s19), %s2657_s17  ;;  %p1591_p11 = scmp.lt.s32.totalorder %s2321_s23, 0 }
  0x4e   : > { %s1537_s2 = sadd.s32 2, %s2661_s19  ;;  %s1592_s16 = ssub.s32 0, %s2321_s23 }
  0x4f   : > { %p1538_p12 = scmp.lt.s32.totalorder %s1537_s2, 17  ;;  %s2119_s1 = smin.u32 %s1592_s16, %s2321_s23 }
  0x50   : > { %s2663_s3 = smov (!%p1558_p8, %s1562_s3), %s1561_s18  ;;  %s1594_s12 = sand.u32 7, %s2119_s1  }
  0x51   : > { %s2665_s2 = smov (!%p1538_p12, %s1537_s2), 17  ;;  %p2117_p13 = scmp.lt.s32.totalorder %s2663_s3, 0 }
  0x52   : > { %s1568_s15 = sadd.s32 8, %s2663_s3  ;;  %s2595_s0 = sld [smem:[#allocation7_spill]] }
  0x53   : > { %s2667_s15 = smov (!%p2117_p13, %s1568_s15), %s2663_s3  ;;  %s1595_s19 = ssub.s32 0, %s1594_s12 }
  0x54   : > { %p1624_p0 = scmp.lt.s32.totalorder %s2325_s25, 0  ;;  %s1570_s8 = sadd.s32 2, %s2667_s15 }
  0x55   : > { %s1625_s16 = ssub.s32 0, %s2325_s25  ;;  %p1571_p1 = scmp.lt.s32.totalorder %s1570_s8, 17 }
  0x56   : > { %s2123_s21 = smin.u32 %s1625_s16, %s2325_s25  ;;  %s2669_s19 = smov (!%p1591_p11, %s1595_s19), %s1594_s12 }
  0x57   : > { %s2671_s8 = smov (!%p1571_p1, %s1570_s8), 17  ;;  %p2121_p2 = scmp.lt.s32.totalorder %s2669_s19, 0 }
  0x58   : > { %s2596_s18 = sld [smem:[#allocation9_spill]]  ;;  %s1601_s27 = sadd.s32 8, %s2669_s19 }
  0x59   : > { %s1627_s7 = sand.u32 7, %s2123_s21   ;;  %s2673_s27 = smov (!%p2121_p2, %s1601_s27), %s2669_s19 }
  0x5a   : > { %s1628_s15 = ssub.s32 0, %s1627_s7  ;;  %p1657_p3 = scmp.lt.s32.totalorder %s2595_s0, 0 }
  0x5b   : > { %s1603_s6 = sadd.s32 2, %s2673_s27  ;;  %s1658_s16 = ssub.s32 0, %s2595_s0 }
  0x5c   : > { %p1604_p4 = scmp.lt.s32.totalorder %s1603_s6, 17  ;;  %s2127_s23 = smin.u32 %s1658_s16, %s2595_s0 }
  0x5d   : > { %s2675_s15 = smov (!%p1624_p0, %s1628_s15), %s1627_s7  ;;  %s2598_s12 = sld [smem:[#allocation8_spill]] }
  0x5e   : > { %s2677_s6 = smov (!%p1604_p4, %s1603_s6), 17  ;;  %p2125_p5 = scmp.lt.s32.totalorder %s2675_s15, 0 }
  0x5f   : > { %s1634_s21 = sadd.s32 8, %s2675_s15  ;;  %s2599_s14 = sld [smem:[#allocation15_spill]] }
  0x60   : > { %s2601_s25 = scalar_lea.vmem %s2594_s10, %s2659_s13  ;;  %s1660_s3 = sand.u32 7, %s2127_s23  }
  0x61   : > { %v1732_v2 = vld [vmem:[%s2601_s25] sm:$0x1]  ;;  %s2679_s21 = smov (!%p2125_p5, %s1634_s21), %s2675_s15  ;;  %s1661_s4 = ssub.s32 0, %s1660_s3 }
  0x62   : > { %p1690_p6 = scmp.lt.s32.totalorder %s2337_s29, 0  ;;  %v1733_v5 = vunpack.c.l.bf16 %v1732_v2  ;;  %s2603_s17 = sld [smem:[#allocation16_spill]] }
  0x63   : > { %s2605_s5 = scalar_lea.vmem %s2545_s11, %s2665_s2  ;;  %s1691_s23 = ssub.s32 0, %s2337_s29 }
  0x64   : > { %v1737_v7 = vld [vmem:[%s2605_s5] sm:$0x1]  ;;  %s2606_s25 = sld [smem:[#allocation14_spill]]  ;;  %s2608_s26 = scalar_lea.vmem %s2543_s9, %s2653_s30 }
  0x65   : > { %s2600_s27 = scalar_lea.vmem %s2599_s14, %s2596_s18  ;;  %v1727_v9 = vld [vmem:[%s2608_s26] sm:$0x1]  ;;  %s2681_s4 = smov (!%p1657_p3, %s1661_s4), %s1660_s3  ;;  %v1738_v11 = vunpack.c.l.bf16 %v1737_v7 }
  0x66   : > { %v1730_v1 = vld [vmem:[%s2600_s27] sm:$0x1]  ;;  %s1636_s27 = sadd.s32 2, %s2679_s21  ;;  %s2609_s18 = sld [smem:[#allocation17_spill]]  ;;  %v1728_v15 = vunpack.c.l.bf16 %v1727_v9 }
  0x67   : > { %v1731_v4 = vunpack.c.l.bf16 %v1730_v1  ;;  %p1637_p7 = scmp.lt.s32.totalorder %s1636_s27, 17  ;;  %s2611_s10 = sld [smem:[#allocation23_spill]] }
  0x68   : > { %s2604_s13 = scalar_lea.vmem %s2603_s17, %s2635_s20  ;;  %s2468_s20 = smin.u32 %s1691_s23, %s2337_s29 }
  0x69   : > { %v1735_v6 = vld [vmem:[%s2604_s13] sm:$0x1]  ;;  %s2683_s27 = smov (!%p1637_p7, %s1636_s27), 17  ;;  %s2613_s26 = sld [smem:[#allocation11_spill]]  ;;  %v1734_v16 = vadd.f32 %v1733_v5, %v1731_v4 }
  0x6a   : > { %s2607_s7 = scalar_lea.vmem %s2606_s25, %s2598_s12  ;;  %v1736_v10 = vunpack.c.l.bf16 %v1735_v6  ;;  %p2129_p8 = scmp.lt.s32.totalorder %s2681_s4, 0 }
  0x6b   : > { %v1725_v8 = vld [vmem:[%s2607_s7] sm:$0x1]  ;;  %s1667_s30 = sadd.s32 8, %s2681_s4  ;;  %s2614_s13 = sld [smem:[#allocation25_spill]]  ;;  %v1769_v24 = vrot.slane %v1734_v16, %v2482_v17 }
  0x6c   : > { %s2610_s12 = scalar_lea.vmem %s2609_s18, %s2637_s22  ;;  %v1726_v14 = vunpack.c.l.bf16 %v1725_v8  ;;  %s2615_s1 = sld [smem:[#allocation10_spill]]  ;;  %v1739_v22 = vadd.f32 %v1738_v11, %v1736_v10 }
  0x6d   : > { %v1740_v12 = vld [vmem:[%s2610_s12] sm:$0x1]  ;;  %s2612_s28 = scalar_lea.vmem %s2611_s10, %s2671_s8  ;;  %s1693_s14 = sand.u32 7, %s2468_s20  }
  0x6e   : > { %v1742_v13 = vld [vmem:[%s2612_s28] sm:$0x1]  ;;  %v1741_v18 = vunpack.c.l.bf16 %v1740_v12  ;;  %s2616_s23 = sld [smem:[#allocation18_spill]]  ;;  %s2618_s7 = sld [smem:[#allocation24_spill]]  ;;  %v1729_v23 = vadd.f32 %v1728_v15, %v1726_v14  ;;  %v1775_v30 = vrot.slane %v1739_v22, %v2482_v17 }
  0x6f   : > { %v1743_v19 = vunpack.c.l.bf16 %v1742_v13  ;;  %s2685_s30 = smov (!%p2129_p8, %s1667_s30), %s2681_s4  ;;  %s1694_s21 = ssub.s32 0, %s1693_s14 }
  0x70   : > { %s2620_s18 = sld [smem:[#allocation20_spill]]  ;;  %s1669_s19 = sadd.s32 2, %s2685_s30  ;;  %v1808_v34 = vsel %vm1807_vm0, %v1729_v23, %v1769_v24 }
  0x71   : > { %s1639_s22 = scalar_lea.vmem %s2614_s13, %s2683_s27  ;;  %s2621_s10 = sld [smem:[#allocation19_spill]]  ;;  %v1744_v29 = vadd.f32 %v1743_v19, %v1741_v18  ;;  %v1810_v39 = vsel %vm1809_vm1, %v1808_v34, %v1775_v30 }
  0x72   : > { %v1752_v28 = vld [vmem:[%s1639_s22] sm:$0x1]  ;;  %p1670_p9 = scmp.lt.s32.totalorder %s1669_s19, 17  ;;  %s2687_s21 = smov (!%p1690_p6, %s1694_s21), %s1693_s14 }
  0x73   : > { %s2623_s4 = sld [smem:[#allocation12_spill]]  ;;  %v1753_v32 = vunpack.c.l.bf16 %v1752_v28  ;;  %p2133_p10 = scmp.lt.s32.totalorder %s2687_s21, 0  ;;  %v1781_v36 = vrot.slane %v1744_v29, %v2482_v17 }
  0x74   : > { %s2617_s15 = scalar_lea.vmem %s2616_s23, %s2639_s24  ;;  %s2619_s2 = scalar_lea.vmem %s2618_s7, %s2677_s6 }
  0x75   : > { %v1745_v20 = vld [vmem:[%s2617_s15] sm:$0x1]  ;;  %s2689_s19 = smov (!%p1670_p9, %s1669_s19), 17  ;;  %s1700_s6 = sadd.s32 8, %s2687_s21  ;;  %v1812_v43 = vsel %vm1811_vm2, %v1810_v39, %v1781_v36 }
  0x76   : > { %v1747_v21 = vld [vmem:[%s2619_s2] sm:$0x1]  ;;  %s1446_s12 = scalar_lea.vmem %s2620_s18, %s2613_s26  ;;  %v1746_v25 = vunpack.c.l.bf16 %v1745_v20  ;;  %s2624_s0 = sld [smem:[#allocation26_spill]] }
  0x77   : > { %v1748_v26 = vunpack.c.l.bf16 %v1747_v21  ;;  %s2622_s28 = scalar_lea.vmem %s2621_s10, %s2615_s1  ;;  %v1755_v33 = vld [vmem:[%s1446_s12] sm:$0x1]  ;;  %s2625_s3 = sld [smem:[#allocation6_spill]] }
  0x78   : > { %v1750_v27 = vld [vmem:[%s2622_s28] sm:$0x1]  ;;  %s2691_s6 = smov (!%p2133_p10, %s1700_s6), %s2687_s21  ;;  %v1756_v37 = vunpack.c.l.bf16 %v1755_v33  ;;  %s2626_s22 = sld [smem:[#allocation21_spill]] }
  0x79   : > { %v1751_v31 = vunpack.c.l.bf16 %v1750_v27  ;;  %v1749_v35 = vadd.f32 %v1748_v26, %v1746_v25  ;;  %s1702_s5 = sadd.s32 2, %s2691_s6  ;;  %s2627_s15 = sld [smem:[#allocation27_spill]] }
  0x7a   : > { %p1703_p11 = scmp.lt.s32.totalorder %s1702_s5, 17  ;;  %s2628_s21 = sld [smem:[#allocation28_spill]] }
  0x7b   : > { %v1754_v40 = vadd.f32 %v1753_v32, %v1751_v31  ;;  %v1787_v42 = vrot.slane %v1749_v35, %v2482_v17 }
  0x7c   : > { %s1672_s13 = scalar_lea.vmem %s2624_s0, %s2689_s19  ;;  %s2693_s5 = smov (!%p1703_p11, %s1702_s5), 17 }
  0x7d   : > { %v1757_v38 = vld [vmem:[%s1672_s13] sm:$0x1]  ;;  %p1721_p12 = scmp.lt.s32.totalorder %s2625_s3, 1  ;;  %v1793_v46 = vrot.slane %v1754_v40, %v2482_v17  ;;  %v1814_v47 = vsel %vm1813_vm3, %v1812_v43, %v1787_v42 }
  0x7e   : > { %s1455_s14 = scalar_lea.vmem %s2626_s22, %s2623_s4  ;;  %v1758_v41 = vunpack.c.l.bf16 %v1757_v38 }
  0x7f   : > { %v1760_v45 = vld [vmem:[%s1455_s14] sm:$0x1]  ;;  %s1705_s16 = scalar_lea.vmem %s2627_s15, %s2693_s5  ;;  %s2695_s3 = smov (!%p1721_p12, %s2625_s3), 1  ;;  %v1816_v52 = vsel %vm1815_vm4, %v1814_v47, %v1793_v46 }
  0x80   : > { %v1759_v44 = vadd.f32 %v1758_v41, %v1756_v37  ;;  %v1761_v48 = vunpack.c.l.bf16 %v1760_v45  ;;  %v1762_v49 = vld [vmem:[%s1705_s16] sm:$0x1]  ;;  %s2134_s25 = sshll.u32 %s2695_s3, 2 }
  0x81   : > { %v1763_v51 = vunpack.c.l.bf16 %v1762_v49  ;;  %s1724_s27 = scalar_lea.vmem %s2628_s21, %s2134_s25 }
  0x82   : > { %v1799_v50 = vrot.slane %v1759_v44, %v2482_v17 }
  0x83   : > { %v1764_v53 = vadd.f32 %v1763_v51, %v1761_v48 }
  0x84   : > { %v1818_v54 = vsel %vm1817_vm5, %v1816_v52, %v1799_v50 }
  0x85   : > { %v1805_v55 = vrot.slane %v1764_v53, %v2482_v17 }
  0x87   : > { %v1820_v56 = vsel %vm1819_vm6, %v1818_v54, %v1805_v55 }
  0x88   : > { %v1821_v57 = vpack.c.bf16 %v1820_v56, %v1820_v56 }
  0x8a   : > { %1823 = vst.msk [vmem:[%s1724_s27] sm:$0xf] %vm1822_vm7, %v1821_v57 }
  0x8b PF: > { %s2629_s20 = sld [smem:[#allocation5_spill]] }
  0x91   : > { %s33_s29 = sadd.s32 1, %s2629_s20  }
  0x92   : > { %p30_p13 = scmp.ge.s32.totalorder %s33_s29, 4  }
  0x94   :  { %32 = sbr.rel (!%p30_p13) target bundleno = 26 (0x1a), region = 159 }

// kernel: opt_forward.7
= control target key start
LH: loop header
LB: loop body
LE: loop exit
PB: predicated region body
PF: predicated region fallthrough
CT: control target
= control target key end

     0   :  { %s897_s24 = smov 0   ;;  %s987_s0 = inlined_call_operand.vmem [shape: bf16[2,8,32], index: 0, kind: input, shape index: {}]   ;;  %s988_s1 = inlined_call_operand.vmem [shape: f32[1,32], index: 1, kind: input, shape index: {}]   ;;  %s989_s2 = inlined_call_operand.vmem [shape: f32[1,32], index: 2, kind: input, shape index: {}]   ;;  %s990_s3 = inlined_call_operand.vmem [shape: bf16[32,96], index: 3, kind: input, shape index: {}]   ;;  %s991_s4 = inlined_call_operand.vmem [shape: f32[1,96], index: 4, kind: input, shape index: {}]   ;;  %s992_s5 = inlined_call_operand.vmem [shape: bf16[32,32], index: 5, kind: input, shape index: {}]   ;;  %s993_s6 = inlined_call_operand.vmem [shape: f32[1,32], index: 6, kind: input, shape index: {}]   ;;  %s994_s7 = inlined_call_operand.vmem [shape: bf16[2,8,32], index: 7, kind: output, shape index: {}]  }
   0x1 LB: > { %s734_s25 = sadd.s32 4294967295, %s847_s24   ;;  %p738_p0 = scmp.ge.s32.totalorder %s847_s24, 1  ;;  %s847_s24 = sphi %s897_s24, %s17_s24  }
   0x2   : > { %p236_p1 = scmp.lt.s32.totalorder %s847_s24, 3 }
   0x4   : > { %p237_p2 = pnand %p738_p0, %p236_p1 }
   0x5   : > { %p266_p3 = scmp.lt.s32.totalorder (!%p237_p2), %s734_s25, 1  ;;  %vm279_vm0 = vcmask (!%p237_p2), 261120   ;;  %v827_v8 = vld [vmem:[%s990_s3] sm:$0xff] (!%p237_p2)   ;;  %v849_v9 = vmov (!%p237_p2), 0.0   ;;  %vm850_vm1 = vmmov (!%p237_p2), 0   ;;  %v828_v10 = vld [vmem:[%s990_s3 + $0x8] sm:$0xff] (!%p237_p2)   ;;  %v375_v33 = vlaneseq (!%p237_p2) }
   0x6   : > { %240 = sbr.rel (%p237_p2) target bundleno = 1605 (0x645), region = 48  ;;  %771 = vmatprep.subr.bf16.mxu0 (!%p237_p2), %v849_v9  ;;  %775 = vmatprep.mubr.msk.bf16.mxu0 (!%p237_p2), %vm850_vm1, %v849_v9  ;;  %v741_v15 = vld [vmem:[%s988_s1] ss:$0 sm:$0xff] (!%p237_p2)  ;;  %s851_s17 = smov (!%p237_p2), 112   ;;  %vm384_vm2 = vcmask (!%p237_p2), 130048   ;;  %vm432_vm4 = vcmask (!%p237_p2), 64512  }
   0x7   : > { %772 = vmatpush3.bf16.msra.mxu0 (!%p237_p2), %v827_v8  ;;  %779 = vmatprep.subr.bf16.mxu1 (!%p237_p2), %v849_v9  ;;  %v742_v17 = vld [vmem:[%s989_s2] ss:$0 sm:$0xff] (!%p237_p2)  ;;  %s852_s18 = smov (!%p237_p2), 96   ;;  %s853_s19 = smov (!%p237_p2), 80   ;;  %v376_v34 = vshrl.u32 (!%p237_p2), %v375_v33, 7  ;;  %v378_v35 = vand.u32 (!%p237_p2), 127, %v375_v33 }
   0x8   : > { %773 = vmatprep.subr.bf16.mxu0 (!%p237_p2), %v849_v9  ;;  %781 = vmatprep.mubr.msk.bf16.mxu1 (!%p237_p2), %vm850_vm1, %v849_v9  ;;  %v743_v21 = vld [vmem:[%s991_s4] ss:$0 sm:$0xff] (!%p237_p2)  ;;  %s854_s20 = smov (!%p237_p2), 64   ;;  %s855_s21 = smov (!%p237_p2), 48   ;;  %vm449_vm5 = vcmask (!%p237_p2), 1043456   ;;  %vm679_vm6 = vcmask (!%p237_p2), 257024  }
   0x9   : > { %vm379_vm3 = vcmp.ge.s32.totalorder (!%p237_p2), %v376_v34, %v378_v35 }
   0xb   : > { %774 = vmatpush3.bf16.msra.mxu0 (!%p237_p2), %v828_v10 }
   0xc   : > { %785 = vmatprep.subr.bf16.mxu0 (!%p237_p2), %v849_v9 }
   0xd   : > { %s996_s25 = smov (!%p266_p3, %s734_s25), 1 }
   0xe   : > { %s739_s26 = sshll.u32 %s996_s25, 2 }
   0xf   : > { %s269_s29 = scalar_lea.vmem %s987_s0, %s739_s26  ;;  %s273_s11 = scalar_lea.vmem %s994_s7, %s739_s26 }
  0x10   : > { %v275_v0 = vld [vmem:[%s269_s29] sm:$0xf]  ;;  %s856_s29 = smov 16  }
  0x11   : > { %v913_v1 = vunpack.c.l.bf16 %v275_v0  ;;  %v829_v0 = vld [vmem:[%s992_s5] sm:$0xff]  }
  0x13   : > { %v280_v2 = vsel %vm279_vm0, %v913_v1, 0.0 }
  0x14   : > { %281 = vadd.xlane.f32.xlu0 %v280_v2 }
  0xa1   : > { %v282_v3 = vpop.xlane.xlu0 %281 }
  0xa2   : > { %v284_v4 = vmul.f32 0.03125, %v282_v3  ;;  %v830_v3 = vld [vmem:[%s992_s5 + $0x8] sm:$0xff]  }
  0xa4   : > { %v285_v5 = vsub.f32 %v913_v1, %v284_v4 }
  0xa6   : > { %v286_v6 = vmul.f32 %v285_v5, %v285_v5 }
  0xa8   : > { %v287_v7 = vsel %vm279_vm0, %v286_v6, 0.0 }
  0xa9   : > { %288 = vadd.xlane.f32.xlu0 %v287_v7 }
 0x136   : > { %v289_v11 = vpop.xlane.xlu0 %288 }
 0x137   : > { %v290_v12 = vmul.f32 0.03125, %v289_v11 }
 0x139   : > { %v291_v13 = vadd.f32 1e-05, %v290_v12 }
 0x13b   : > { %831 = vrsqrt.f32 %v291_v13 }
 0x145   : > { %v832_v14 = vpop.eup %831 }
 0x146   : > { %v293_v16 = vmul.f32 %v832_v14, %v285_v5 }
 0x148   : > { %v300_v18 = vmul.f32 %v741_v15, %v293_v16 }
 0x14a   : > { %v307_v19 = vadd.f32 %v742_v17, %v300_v18 }
 0x14c   : > { %v308_v20 = vpack.c.bf16 %v307_v19, %v307_v19 }
 0x14e   : > { %776 = vmatmul.mubr.msk.bf16.vlgmr.msra.gmra.mrb[0].mxu0 %vm279_vm0, %v308_v20  ;;  %v751_v20 = vld [vmem:[%s993_s6] ss:$0 sm:$0xff] }
 0x14f   : > { %787 = vmatprep.mubr.msk.bf16.mxu0 %vm850_vm1, %v849_v9 }
 0x221   : > { %v369_v22 = vpop.f32.mrb[0].mxu0 }
 0x222   : > { %v370_v23 = vadd.f32 %v743_v21, %v369_v22  ;;  %v777_v24 = vpop.f32.mrb[1].mxu0 }
 0x223   : > { %v372_v25 = vpop.f32.mrb[2].mxu0 }
 0x224   : > { %v380_v26 = vpack.c.bf16 %v370_v23, %v370_v23  ;;  %v778_v27 = vpop.f32.mrb[3].mxu0 }
 0x226   : > { %494 = vrot.lane.b32.xlu0 %v380_v26, %s851_s17  ;;  %382 = vrot.lane.b32.xlu1 %v380_v26, %s852_s18 }
 0x22a   : > { %496 = vrot.lane.b32.xlu1 %v380_v26, %s853_s19 }
 0x298   : > { %v383_v28 = vpop.permute.xlu1 %382  ;;  %v495_v32 = vpop.permute.xlu0 %494 }
 0x299   : > { %v389_v29 = vsel %vm384_vm2, %v383_v28, 0 }
 0x29a   : > { %780 = vmatpush3.bf16.xpose.msra.mxu1 %v389_v29 }
 0x29b   : > { %791 = vmatprep.subr.bf16.mxu1 %v849_v9 }
 0x29c   : > { %v497_v30 = vpop.permute.xlu1 %496 }
 0x29d   : > { %v502_v31 = vsel %vm384_vm2, %v497_v30, 0 }
 0x2a1   : > { %782 = vmatmul.mubr.msk.bf16.vlgmr.msra.gmra.mrb[0].mxu1 %vm384_vm2, %v380_v26 }
 0x2a2   : > { %792 = vmatpush3.bf16.xpose.msra.mxu1 %v502_v31  ;;  %793 = vmatprep.mubr.msk.bf16.mxu1 %vm850_vm1, %v849_v9 }
 0x2a3   : > { %803 = vmatprep.subr.bf16.mxu1 %v849_v9 }
 0x2a9   : > { %794 = vmatmul.mubr.msk.bf16.vlgmr.msra.gmra.mrb[4].mxu1 %vm384_vm2, %v495_v32 }
 0x2aa   : > { %807 = vmatprep.mubr.msk.bf16.mxu1 %vm850_vm1, %v849_v9  ;;  %804 = vmatpush3.bf16.msra.mxu1 %v829_v0 }
 0x2ab   : > { %805 = vmatprep.subr.bf16.mxu1 %v849_v9 }
 0x2ae   : > { %806 = vmatpush3.bf16.msra.mxu1 %v830_v3 }
 0x374   : > { %v425_v36 = vpop.f32.mrb[0].mxu1 }
 0x375   : > { %v431_v37 = vsel %vm379_vm3, %v425_v36, -inf  ;;  %v783_v38 = vpop.f32.mrb[1].mxu1 }
 0x376   : > { %v428_v39 = vpop.f32.mrb[2].mxu1  ;;  %v433_v40 = vsel %vm432_vm4, %v431_v37, -inf }
 0x377   : > { %434 = vmax.xlane.f32.xlu1 %v433_v40  ;;  %v784_v41 = vpop.f32.mrb[3].mxu1 }
 0x37c   : > { %v538_v42 = vpop.f32.mrb[4].mxu1 }
 0x37d   : > { %v544_v43 = vsel %vm379_vm3, %v538_v42, -inf  ;;  %v795_v44 = vpop.f32.mrb[5].mxu1 }
 0x37e   : > { %v541_v45 = vpop.f32.mrb[6].mxu1  ;;  %v545_v46 = vsel %vm432_vm4, %v544_v43, -inf }
 0x37f   : > { %546 = vmax.xlane.f32.xlu0 %v545_v46  ;;  %v796_v47 = vpop.f32.mrb[7].mxu1 }
 0x388   : > { %444 = vrot.lane.b32.xlu1 %v380_v26, %s854_s20 }
 0x395   : > { %556 = vrot.lane.b32.xlu0 %v380_v26, %s855_s21 }
 0x404   : > { %v435_v48 = vpop.xlane.xlu1 %434 }
 0x405   : > { %v436_v49 = vsub.f32 %v431_v37, %v435_v48 }
 0x407   : > { %v437_v50 = vmul.f32 1.442695, %v436_v49 }
 0x408   : > { %v445_v51 = vpop.permute.xlu1 %444 }
 0x409   : > { %833 = vpow2.f32 %v437_v50  ;;  %v451_v52 = vsel %vm449_vm5, %v445_v51, 0 }
 0x40a   : > { %786 = vmatpush3.bf16.msra.mxu0 %v451_v52 }
 0x40b   : > { %797 = vmatprep.subr.bf16.mxu0 %v849_v9 }
 0x40c   : > { %v547_v53 = vpop.xlane.xlu0 %546 }
 0x40d   : > { %v548_v54 = vsub.f32 %v544_v43, %v547_v53 }
 0x40f   : > { %v549_v55 = vmul.f32 1.442695, %v548_v54 }
 0x410   : > { %v557_v57 = vpop.permute.xlu0 %556 }
 0x411   : > { %835 = vpow2.f32 %v549_v55  ;;  %v562_v60 = vsel %vm449_vm5, %v557_v57, 0 }
 0x413   : > { %v834_v56 = vpop.eup %833 }
 0x414   : > { %v439_v58 = vsel %vm432_vm4, %v834_v56, 0.0  ;;  %v443_v59 = vpack.c.bf16 %v834_v56, %v834_v56 }
 0x415   : > { %440 = vadd.xlane.f32.xlu0 %v439_v58 }
 0x416   : > { %788 = vmatmul.mubr.msk.bf16.vlgmr.msra.gmra.mrb[4].mxu0 %vm432_vm4, %v443_v59 }
 0x417   : > { %798 = vmatpush3.bf16.msra.mxu0 %v562_v60  ;;  %799 = vmatprep.mubr.msk.bf16.mxu0 %vm850_vm1, %v849_v9 }
 0x41b   : > { %v836_v61 = vpop.eup %835 }
 0x41c   : > { %v551_v62 = vsel %vm432_vm4, %v836_v61, 0.0  ;;  %v555_v63 = vpack.c.bf16 %v836_v61, %v836_v61 }
 0x41d   : > { %552 = vadd.xlane.f32.xlu1 %v551_v62 }
 0x41e   : > { %800 = vmatmul.mubr.msk.bf16.vlgmr.msra.gmra.mrb[8].mxu0 %vm432_vm4, %v555_v63 }
 0x4a2   : > { %v441_v9 = vpop.xlane.xlu0 %440 }
 0x4aa   : > { %v553_v2 = vpop.xlane.xlu1 %552 }
 0x4ab   : > { %837 = vrcp.f32 %v553_v2 }
 0x4ac   : > { %839 = vrcp.f32 %v441_v9 }
 0x4b5   : > { %v838_v8 = vpop.eup %837 }
 0x4b6   : > { %v840_v15 = vpop.eup %839 }
 0x4e9   : > { %v487_v4 = vpop.f32.mrb[4].mxu0 }
 0x4ea   : > { %v789_v5 = vpop.f32.mrb[5].mxu0  ;;  %v493_v16 = vmul.f32 %v840_v15, %v487_v4 }
 0x4eb   : > { %v490_v6 = vpop.f32.mrb[6].mxu0 }
 0x4ec   : > { %v790_v7 = vpop.f32.mrb[7].mxu0 }
 0x4f1   : > { %v598_v10 = vpop.f32.mrb[8].mxu0 }
 0x4f2   : > { %v604_v11 = vmul.f32 %v838_v8, %v598_v10  ;;  %v801_v12 = vpop.f32.mrb[9].mxu0 }
 0x4f3   : > { %v601_v13 = vpop.f32.mrb[10].mxu0 }
 0x4f4   : > { %606 = vrot.lane.b32.xlu1 %v604_v11, %s856_s29  ;;  %v802_v14 = vpop.f32.mrb[11].mxu0 }
 0x566   : > { %v607_v17 = vpop.permute.xlu1 %606 }
 0x567   : > { %v609_v18 = vsel %vm384_vm2, %v493_v16, %v607_v17 }
 0x568   : > { %v610_v19 = vpack.c.bf16 %v609_v18, %v609_v18 }
 0x56a   : > { %808 = vmatmul.mubr.msk.bf16.vlgmr.msra.gmra.mrb[8].mxu1 %vm279_vm0, %v610_v19 }
 0x63d   : > { %v671_v21 = vpop.f32.mrb[8].mxu1 }
 0x63e   : > { %v672_v22 = vadd.f32 %v751_v20, %v671_v21  ;;  %v809_v23 = vpop.f32.mrb[9].mxu1 }
 0x63f   : > { %v674_v24 = vpop.f32.mrb[10].mxu1 }
 0x640   : > { %v677_v25 = vadd.f32 %v672_v22, %v913_v1  ;;  %v810_v26 = vpop.f32.mrb[11].mxu1 }
 0x642   : > { %v678_v27 = vpack.c.bf16 %v677_v25, %v677_v25 }
 0x644   : > { %680 = vst.msk [vmem:[%s273_s11] sm:$0xf] %vm679_vm6, %v678_v27 }
 0x645 PF: > { %s17_s24 = sadd.s32 1, %s847_s24  }
 0x646   : > { %p14_p4 = scmp.ge.s32.totalorder %s17_s24, 4  }
 0x648   :  { %16 = sbr.rel (!%p14_p4) target bundleno = 1 (0x1), region = 78 }

</bundles_post_ra>
